<compile_context>
chip_gen: v7x
topology: tpu7x:2x2x1
jax: 0.10.0
libtpu: 0.0.40
codegen_flags: <defaults>
</compile_context>

<pallas_src>
import functools
import math

import jax
import jax.numpy as jnp
from jax.experimental import pallas as pl
from jax.experimental.pallas import tpu as pltpu

WIDTH = 128
IN_FEATURES = 28 * 28          # 784
OUT_FEATURES = 10
OUT_PAD = 128                  # lane-dense output width; sliced to 10 in the wrapper
N_LINEAR = 9                   # 784->128, 7 x 128->128, 128->10
N_HIDDEN_W = 7                 # stacked (128,128) hidden weights

_TM_MAX = 1024                 # ~8 MiB/tile footprint: fits every generation's scoped VMEM


def _round_up(x, m):
    return ((x + m - 1) // m) * m


def _pick_tm(B):
    """Batch tile size: big tiles for large B, but >=2 grid steps once B >= 16 (v7x 2-TC)."""
    if B <= 8:
        return 8
    if B >= 2 * _TM_MAX:
        return _TM_MAX                                    # multiple of 256, fills MXU M dim
    return min(_TM_MAX, _round_up(pl.cdiv(B, 2), 8))      # exactly 2 balanced tiles


def _act_dtype_for_device():
    """bf16 Mish on v6e/v7x (bf16 EUP/VPU); f32 on v5e and older / unknown backends."""
    try:
        kind = jax.devices()[0].device_kind.lower()
    except Exception:
        return jnp.float32
    if any(tag in kind for tag in ("v6", "v7")):
        return jnp.bfloat16
    return jnp.float32


def _mish(x):
    # Mish(x) = x * tanh(softplus(x)) == x * n / (n + 2) with n = y*(y+2), y = e^x.
    # 1 EUP exp (in x's dtype) + 1 f32 approx reciprocal; clamp keeps y^2 finite
    # (for x >= 20 the ratio is already 1.0 to f32 precision).
    y = jnp.exp(jnp.minimum(x, jnp.asarray(20.0, x.dtype)))
    n = y * (y + jnp.asarray(2.0, x.dtype))
    r = pl.reciprocal(n.astype(jnp.float32) + 2.0, approx=True).astype(x.dtype)
    return x * n * r


def mlp_mish_kernel(x_ref, w0_ref, wh_ref, wout_ref, b_ref, o_ref, *, act_dtype):
    # x_ref:    (TM, 784)      f32
    # w0_ref:   (784, 128)     bf16
    # wh_ref:   (7, 128, 128)  bf16  (hidden layers 1..7)
    # wout_ref: (128, 128)     bf16  (zero-padded cols 10..127)
    # b_ref:    (9, 128)       f32   (row i = bias of linear i, zero-padded)
    # o_ref:    (TM, 128)      f32   (cols 10..127 are padding)
    h = jnp.dot(x_ref[...].astype(jnp.bfloat16), w0_ref[...],
                preferred_element_type=jnp.float32) + b_ref[0:1, :]
    h = _mish(h.astype(act_dtype))
    for j in range(N_HIDDEN_W):                     # layers 1..7, unrolled
        h = jnp.dot(h.astype(jnp.bfloat16), wh_ref[j],
                    preferred_element_type=jnp.float32) + b_ref[j + 1:j + 2, :]
        h = _mish(h.astype(act_dtype))
    h = jnp.dot(h.astype(jnp.bfloat16), wout_ref[...],
                preferred_element_type=jnp.float32) + b_ref[8:9, :]
    o_ref[...] = h.astype(o_ref.dtype)


def init_params(key):
    """PyTorch Linear-style init (uniform +/- 1/sqrt(fan_in)); weights stored (in, out)."""
    dims = [IN_FEATURES] + [WIDTH] * 8 + [OUT_FEATURES]
    params = []
    for i in range(len(dims) - 1):
        fan_in, fan_out = dims[i], dims[i + 1]
        key, kw, kb = jax.random.split(key, 3)
        bound = 1.0 / math.sqrt(fan_in)
        w = jax.random.uniform(kw, (fan_in, fan_out), jnp.float32, -bound, bound)
        b = jax.random.uniform(kb, (fan_out,), jnp.float32, -bound, bound)
        params.append((w, b))
    return params


def pack_params(params):
    """Pack 19 small tensors into 4 slabs (bf16 matmul weights, f32 biases). w0 unpadded."""
    w0, _ = params[0]                                                    # (784, 128)
    wh = jnp.stack([params[i][0] for i in range(1, 1 + N_HIDDEN_W)])     # (7, 128, 128)
    w8, _ = params[8]
    woutp = jnp.zeros((WIDTH, OUT_PAD), jnp.float32).at[:, :OUT_FEATURES].set(w8)
    biases = jnp.zeros((N_LINEAR, OUT_PAD), jnp.float32)
    for i, (_, b) in enumerate(params):
        biases = biases.at[i, : b.shape[0]].set(b)
    return (w0.astype(jnp.bfloat16), wh.astype(jnp.bfloat16),
            woutp.astype(jnp.bfloat16), biases)


def simple_mlp_mish_forward(x_nchw, packed, act_dtype=None):
    if act_dtype is None:
        act_dtype = _act_dtype_for_device()
    w0, wh, wout, biases = packed
    B = x_nchw.shape[0]
    x_flat = x_nchw.reshape(B, IN_FEATURES).astype(jnp.float32)   # nn.Flatten(); no pad copies

    TM = _pick_tm(B)
    grid = (pl.cdiv(B, TM),)   # partial final block handled by Pallas (masked writes)

    kernel = functools.partial(mlp_mish_kernel, act_dtype=act_dtype)
    out = pl.pallas_call(
        kernel,
        out_shape=jax.ShapeDtypeStruct((B, OUT_PAD), jnp.float32),
        grid=grid,
        in_specs=[
            pl.BlockSpec((TM, IN_FEATURES), lambda i: (i, 0)),    # x: tiled over batch only
            pl.BlockSpec(w0.shape, lambda i: (0, 0)),             # weights: resident slabs
            pl.BlockSpec(wh.shape, lambda i: (0, 0, 0)),
            pl.BlockSpec(wout.shape, lambda i: (0, 0)),
            pl.BlockSpec(biases.shape, lambda i: (0, 0)),
        ],
        out_specs=pl.BlockSpec((TM, OUT_PAD), lambda i: (i, 0)),  # lane-dense store
        compiler_params=pltpu.CompilerParams(
            dimension_semantics=("parallel",),                    # shard batch tiles (v7x 2 TCs)
            vmem_limit_bytes=32 * 1024 * 1024,                    # headroom for TM up to 1024 on v5e
        ),
    )(x_flat, w0, wh, wout, biases)
    return out[:, :OUT_FEATURES]


def reference_forward(x_nchw, params, act_dtype):
    """Pure-JAX reference mirroring the kernel's precision choices (bf16 dot inputs, f32 acc,
    activation rounded to act_dtype before Mish), with canonical x*tanh(softplus(x)) Mish."""
    h = x_nchw.reshape(x_nchw.shape[0], -1).astype(jnp.float32)
    n = len(params)
    for i, (w, b) in enumerate(params):
        h = jnp.dot(h.astype(jnp.bfloat16), w.astype(jnp.bfloat16),
                    preferred_element_type=jnp.float32) + b
        if i < n - 1:
            ha = h.astype(act_dtype).astype(jnp.float32)
            h = ha * jnp.tanh(jax.nn.softplus(ha))
    return h


if __name__ == "__main__":
    key = jax.random.PRNGKey(0)
    key, kx = jax.random.split(key)

    # FMNIST-shaped input, NCHW like PyTorch. B=24 exercises 2 batch tiles on the
    # parallel grid axis, including a partial final block (no batch padding copy).
    B = 24
    x = jax.random.normal(kx, (B, 1, 28, 28), dtype=jnp.float32)

    params = init_params(jax.random.PRNGKey(0))
    packed = pack_params(params)

    act_dtype = _act_dtype_for_device()
    out = simple_mlp_mish_forward(x, packed, act_dtype=act_dtype)
    out = jax.block_until_ready(out)

    ref = reference_forward(x, params, act_dtype)
    assert out.shape == (B, OUT_FEATURES)
    assert bool(jnp.all(jnp.isfinite(out)))
    # tolerance absorbs the approx-reciprocal rational Mish (and bf16 Mish math on v6e/v7x)
    tol = 1e-2 if act_dtype == jnp.float32 else 3e-2
    assert jnp.allclose(out, ref, atol=tol, rtol=tol), float(jnp.max(jnp.abs(out - ref)))

    print("KERNEL_OK")
</pallas_src>

<mosaic_0001>
module attributes {stable_mosaic.version = 11 : i64} {
  func.func @mlp_mish_kernel(%arg0: i32, %arg1: memref<16x784xf32, #tpu.memory_space<vmem>>, %arg2: memref<784x128xbf16, #tpu.memory_space<vmem>>, %arg3: memref<7x128x128xbf16, #tpu.memory_space<vmem>>, %arg4: memref<128x128xbf16, #tpu.memory_space<vmem>>, %arg5: memref<9x128xf32, #tpu.memory_space<vmem>>, %arg6: memref<16x128xf32, #tpu.memory_space<vmem>>) attributes {dimension_semantics = [#tpu.dimension_semantics<parallel>], iteration_bounds = array<i64: 2>, scalar_prefetch = 0 : i64, scratch_operands = 0 : i64, tpu.core_type = #tpu.core_type<tc>, window_params = [{transform_indices = @transform_0, window_bounds = array<i64: 16, 784>}, {pipeline_mode = #tpu.pipeline_mode<synchronous>, transform_indices = @transform_1, window_bounds = array<i64: 784, 128>}, {pipeline_mode = #tpu.pipeline_mode<synchronous>, transform_indices = @transform_2, window_bounds = array<i64: 7, 128, 128>}, {pipeline_mode = #tpu.pipeline_mode<synchronous>, transform_indices = @transform_3, window_bounds = array<i64: 128, 128>}, {pipeline_mode = #tpu.pipeline_mode<synchronous>, transform_indices = @transform_4, window_bounds = array<i64: 9, 128>}, {transform_indices = @transform_5, window_bounds = array<i64: 16, 128>}]} {
    %c0 = arith.constant 0 : index
    %c0_0 = arith.constant 0 : index
    %0 = vector.load %arg1[%c0, %c0_0] : memref<16x784xf32, #tpu.memory_space<vmem>>, vector<16x784xf32>
    %1 = arith.truncf %0 : vector<16x784xf32> to vector<16x784xbf16>
    %c0_1 = arith.constant 0 : index
    %c0_2 = arith.constant 0 : index
    %2 = vector.load %arg2[%c0_1, %c0_2] : memref<784x128xbf16, #tpu.memory_space<vmem>>, vector<784x128xbf16>
    %cst = arith.constant dense<0.000000e+00> : vector<16x128xf32>
    %3 = tpu.matmul %1, %2, %cst {dimension_numbers = #tpu.dot_dimension_numbers<[1], [0], [0], [1], [0, 0, 1, 1], [], []>} : vector<16x784xbf16>, vector<784x128xbf16>, vector<16x128xf32> -> vector<16x128xf32>
    %c0_3 = arith.constant 0 : index
    %c0_4 = arith.constant 0 : index
    %4 = vector.load %arg5[%c0_3, %c0_4] : memref<9x128xf32, #tpu.memory_space<vmem>>, vector<1x128xf32>
    %5 = vector.broadcast %4 : vector<1x128xf32> to vector<16x128xf32>
    %6 = arith.addf %3, %5 : vector<16x128xf32>
    %cst_5 = arith.constant 2.000000e+01 : f32
    %7 = vector.broadcast %cst_5 : f32 to vector<16x128xf32>
    %8 = arith.minimumf %6, %7 : vector<16x128xf32>
    %9 = math.exp %8 : vector<16x128xf32>
    %cst_6 = arith.constant 2.000000e+00 : f32
    %10 = vector.broadcast %cst_6 : f32 to vector<16x128xf32>
    %11 = arith.addf %9, %10 : vector<16x128xf32>
    %12 = arith.mulf %9, %11 : vector<16x128xf32>
    %cst_7 = arith.constant 2.000000e+00 : f32
    %13 = vector.broadcast %cst_7 : f32 to vector<16x128xf32>
    %14 = arith.addf %12, %13 : vector<16x128xf32>
    %15 = tpu.reciprocal %14 {approx = true} : vector<16x128xf32> -> vector<16x128xf32>
    %16 = arith.mulf %6, %12 : vector<16x128xf32>
    %17 = arith.mulf %16, %15 : vector<16x128xf32>
    %18 = arith.truncf %17 : vector<16x128xf32> to vector<16x128xbf16>
    %c0_8 = arith.constant 0 : index
    %c0_9 = arith.constant 0 : index
    %c0_10 = arith.constant 0 : index
    %19 = vector.load %arg3[%c0_8, %c0_9, %c0_10] : memref<7x128x128xbf16, #tpu.memory_space<vmem>>, vector<1x128x128xbf16>
    %20 = vector.shape_cast %19 : vector<1x128x128xbf16> to vector<128x128xbf16>
    %cst_11 = arith.constant dense<0.000000e+00> : vector<16x128xf32>
    %21 = tpu.matmul %18, %20, %cst_11 {dimension_numbers = #tpu.dot_dimension_numbers<[1], [0], [0], [1], [0, 0, 1, 1], [], []>} : vector<16x128xbf16>, vector<128x128xbf16>, vector<16x128xf32> -> vector<16x128xf32>
    %c1 = arith.constant 1 : index
    %c0_12 = arith.constant 0 : index
    %22 = vector.load %arg5[%c1, %c0_12] : memref<9x128xf32, #tpu.memory_space<vmem>>, vector<1x128xf32>
    %23 = vector.broadcast %22 : vector<1x128xf32> to vector<16x128xf32>
    %24 = arith.addf %21, %23 : vector<16x128xf32>
    %cst_13 = arith.constant 2.000000e+01 : f32
    %25 = vector.broadcast %cst_13 : f32 to vector<16x128xf32>
    %26 = arith.minimumf %24, %25 : vector<16x128xf32>
    %27 = math.exp %26 : vector<16x128xf32>
    %cst_14 = arith.constant 2.000000e+00 : f32
    %28 = vector.broadcast %cst_14 : f32 to vector<16x128xf32>
    %29 = arith.addf %27, %28 : vector<16x128xf32>
    %30 = arith.mulf %27, %29 : vector<16x128xf32>
    %cst_15 = arith.constant 2.000000e+00 : f32
    %31 = vector.broadcast %cst_15 : f32 to vector<16x128xf32>
    %32 = arith.addf %30, %31 : vector<16x128xf32>
    %33 = tpu.reciprocal %32 {approx = true} : vector<16x128xf32> -> vector<16x128xf32>
    %34 = arith.mulf %24, %30 : vector<16x128xf32>
    %35 = arith.mulf %34, %33 : vector<16x128xf32>
    %36 = arith.truncf %35 : vector<16x128xf32> to vector<16x128xbf16>
    %c1_16 = arith.constant 1 : index
    %c0_17 = arith.constant 0 : index
    %c0_18 = arith.constant 0 : index
    %37 = vector.load %arg3[%c1_16, %c0_17, %c0_18] : memref<7x128x128xbf16, #tpu.memory_space<vmem>>, vector<1x128x128xbf16>
    %38 = vector.shape_cast %37 : vector<1x128x128xbf16> to vector<128x128xbf16>
    %cst_19 = arith.constant dense<0.000000e+00> : vector<16x128xf32>
    %39 = tpu.matmul %36, %38, %cst_19 {dimension_numbers = #tpu.dot_dimension_numbers<[1], [0], [0], [1], [0, 0, 1, 1], [], []>} : vector<16x128xbf16>, vector<128x128xbf16>, vector<16x128xf32> -> vector<16x128xf32>
    %c2 = arith.constant 2 : index
    %c0_20 = arith.constant 0 : index
    %40 = vector.load %arg5[%c2, %c0_20] : memref<9x128xf32, #tpu.memory_space<vmem>>, vector<1x128xf32>
    %41 = vector.broadcast %40 : vector<1x128xf32> to vector<16x128xf32>
    %42 = arith.addf %39, %41 : vector<16x128xf32>
    %cst_21 = arith.constant 2.000000e+01 : f32
    %43 = vector.broadcast %cst_21 : f32 to vector<16x128xf32>
    %44 = arith.minimumf %42, %43 : vector<16x128xf32>
    %45 = math.exp %44 : vector<16x128xf32>
    %cst_22 = arith.constant 2.000000e+00 : f32
    %46 = vector.broadcast %cst_22 : f32 to vector<16x128xf32>
    %47 = arith.addf %45, %46 : vector<16x128xf32>
    %48 = arith.mulf %45, %47 : vector<16x128xf32>
    %cst_23 = arith.constant 2.000000e+00 : f32
    %49 = vector.broadcast %cst_23 : f32 to vector<16x128xf32>
    %50 = arith.addf %48, %49 : vector<16x128xf32>
    %51 = tpu.reciprocal %50 {approx = true} : vector<16x128xf32> -> vector<16x128xf32>
    %52 = arith.mulf %42, %48 : vector<16x128xf32>
    %53 = arith.mulf %52, %51 : vector<16x128xf32>
    %54 = arith.truncf %53 : vector<16x128xf32> to vector<16x128xbf16>
    %c2_24 = arith.constant 2 : index
    %c0_25 = arith.constant 0 : index
    %c0_26 = arith.constant 0 : index
    %55 = vector.load %arg3[%c2_24, %c0_25, %c0_26] : memref<7x128x128xbf16, #tpu.memory_space<vmem>>, vector<1x128x128xbf16>
    %56 = vector.shape_cast %55 : vector<1x128x128xbf16> to vector<128x128xbf16>
    %cst_27 = arith.constant dense<0.000000e+00> : vector<16x128xf32>
    %57 = tpu.matmul %54, %56, %cst_27 {dimension_numbers = #tpu.dot_dimension_numbers<[1], [0], [0], [1], [0, 0, 1, 1], [], []>} : vector<16x128xbf16>, vector<128x128xbf16>, vector<16x128xf32> -> vector<16x128xf32>
    %c3 = arith.constant 3 : index
    %c0_28 = arith.constant 0 : index
    %58 = vector.load %arg5[%c3, %c0_28] : memref<9x128xf32, #tpu.memory_space<vmem>>, vector<1x128xf32>
    %59 = vector.broadcast %58 : vector<1x128xf32> to vector<16x128xf32>
    %60 = arith.addf %57, %59 : vector<16x128xf32>
    %cst_29 = arith.constant 2.000000e+01 : f32
    %61 = vector.broadcast %cst_29 : f32 to vector<16x128xf32>
    %62 = arith.minimumf %60, %61 : vector<16x128xf32>
    %63 = math.exp %62 : vector<16x128xf32>
    %cst_30 = arith.constant 2.000000e+00 : f32
    %64 = vector.broadcast %cst_30 : f32 to vector<16x128xf32>
    %65 = arith.addf %63, %64 : vector<16x128xf32>
    %66 = arith.mulf %63, %65 : vector<16x128xf32>
    %cst_31 = arith.constant 2.000000e+00 : f32
    %67 = vector.broadcast %cst_31 : f32 to vector<16x128xf32>
    %68 = arith.addf %66, %67 : vector<16x128xf32>
    %69 = tpu.reciprocal %68 {approx = true} : vector<16x128xf32> -> vector<16x128xf32>
    %70 = arith.mulf %60, %66 : vector<16x128xf32>
    %71 = arith.mulf %70, %69 : vector<16x128xf32>
    %72 = arith.truncf %71 : vector<16x128xf32> to vector<16x128xbf16>
    %c3_32 = arith.constant 3 : index
    %c0_33 = arith.constant 0 : index
    %c0_34 = arith.constant 0 : index
    %73 = vector.load %arg3[%c3_32, %c0_33, %c0_34] : memref<7x128x128xbf16, #tpu.memory_space<vmem>>, vector<1x128x128xbf16>
    %74 = vector.shape_cast %73 : vector<1x128x128xbf16> to vector<128x128xbf16>
    %cst_35 = arith.constant dense<0.000000e+00> : vector<16x128xf32>
    %75 = tpu.matmul %72, %74, %cst_35 {dimension_numbers = #tpu.dot_dimension_numbers<[1], [0], [0], [1], [0, 0, 1, 1], [], []>} : vector<16x128xbf16>, vector<128x128xbf16>, vector<16x128xf32> -> vector<16x128xf32>
    %c4 = arith.constant 4 : index
    %c0_36 = arith.constant 0 : index
    %76 = vector.load %arg5[%c4, %c0_36] : memref<9x128xf32, #tpu.memory_space<vmem>>, vector<1x128xf32>
    %77 = vector.broadcast %76 : vector<1x128xf32> to vector<16x128xf32>
    %78 = arith.addf %75, %77 : vector<16x128xf32>
    %cst_37 = arith.constant 2.000000e+01 : f32
    %79 = vector.broadcast %cst_37 : f32 to vector<16x128xf32>
    %80 = arith.minimumf %78, %79 : vector<16x128xf32>
    %81 = math.exp %80 : vector<16x128xf32>
    %cst_38 = arith.constant 2.000000e+00 : f32
    %82 = vector.broadcast %cst_38 : f32 to vector<16x128xf32>
    %83 = arith.addf %81, %82 : vector<16x128xf32>
    %84 = arith.mulf %81, %83 : vector<16x128xf32>
    %cst_39 = arith.constant 2.000000e+00 : f32
    %85 = vector.broadcast %cst_39 : f32 to vector<16x128xf32>
    %86 = arith.addf %84, %85 : vector<16x128xf32>
    %87 = tpu.reciprocal %86 {approx = true} : vector<16x128xf32> -> vector<16x128xf32>
    %88 = arith.mulf %78, %84 : vector<16x128xf32>
    %89 = arith.mulf %88, %87 : vector<16x128xf32>
    %90 = arith.truncf %89 : vector<16x128xf32> to vector<16x128xbf16>
    %c4_40 = arith.constant 4 : index
    %c0_41 = arith.constant 0 : index
    %c0_42 = arith.constant 0 : index
    %91 = vector.load %arg3[%c4_40, %c0_41, %c0_42] : memref<7x128x128xbf16, #tpu.memory_space<vmem>>, vector<1x128x128xbf16>
    %92 = vector.shape_cast %91 : vector<1x128x128xbf16> to vector<128x128xbf16>
    %cst_43 = arith.constant dense<0.000000e+00> : vector<16x128xf32>
    %93 = tpu.matmul %90, %92, %cst_43 {dimension_numbers = #tpu.dot_dimension_numbers<[1], [0], [0], [1], [0, 0, 1, 1], [], []>} : vector<16x128xbf16>, vector<128x128xbf16>, vector<16x128xf32> -> vector<16x128xf32>
    %c5 = arith.constant 5 : index
    %c0_44 = arith.constant 0 : index
    %94 = vector.load %arg5[%c5, %c0_44] : memref<9x128xf32, #tpu.memory_space<vmem>>, vector<1x128xf32>
    %95 = vector.broadcast %94 : vector<1x128xf32> to vector<16x128xf32>
    %96 = arith.addf %93, %95 : vector<16x128xf32>
    %cst_45 = arith.constant 2.000000e+01 : f32
    %97 = vector.broadcast %cst_45 : f32 to vector<16x128xf32>
    %98 = arith.minimumf %96, %97 : vector<16x128xf32>
    %99 = math.exp %98 : vector<16x128xf32>
    %cst_46 = arith.constant 2.000000e+00 : f32
    %100 = vector.broadcast %cst_46 : f32 to vector<16x128xf32>
    %101 = arith.addf %99, %100 : vector<16x128xf32>
    %102 = arith.mulf %99, %101 : vector<16x128xf32>
    %cst_47 = arith.constant 2.000000e+00 : f32
    %103 = vector.broadcast %cst_47 : f32 to vector<16x128xf32>
    %104 = arith.addf %102, %103 : vector<16x128xf32>
    %105 = tpu.reciprocal %104 {approx = true} : vector<16x128xf32> -> vector<16x128xf32>
    %106 = arith.mulf %96, %102 : vector<16x128xf32>
    %107 = arith.mulf %106, %105 : vector<16x128xf32>
    %108 = arith.truncf %107 : vector<16x128xf32> to vector<16x128xbf16>
    %c5_48 = arith.constant 5 : index
    %c0_49 = arith.constant 0 : index
    %c0_50 = arith.constant 0 : index
    %109 = vector.load %arg3[%c5_48, %c0_49, %c0_50] : memref<7x128x128xbf16, #tpu.memory_space<vmem>>, vector<1x128x128xbf16>
    %110 = vector.shape_cast %109 : vector<1x128x128xbf16> to vector<128x128xbf16>
    %cst_51 = arith.constant dense<0.000000e+00> : vector<16x128xf32>
    %111 = tpu.matmul %108, %110, %cst_51 {dimension_numbers = #tpu.dot_dimension_numbers<[1], [0], [0], [1], [0, 0, 1, 1], [], []>} : vector<16x128xbf16>, vector<128x128xbf16>, vector<16x128xf32> -> vector<16x128xf32>
    %c6 = arith.constant 6 : index
    %c0_52 = arith.constant 0 : index
    %112 = vector.load %arg5[%c6, %c0_52] : memref<9x128xf32, #tpu.memory_space<vmem>>, vector<1x128xf32>
    %113 = vector.broadcast %112 : vector<1x128xf32> to vector<16x128xf32>
    %114 = arith.addf %111, %113 : vector<16x128xf32>
    %cst_53 = arith.constant 2.000000e+01 : f32
    %115 = vector.broadcast %cst_53 : f32 to vector<16x128xf32>
    %116 = arith.minimumf %114, %115 : vector<16x128xf32>
    %117 = math.exp %116 : vector<16x128xf32>
    %cst_54 = arith.constant 2.000000e+00 : f32
    %118 = vector.broadcast %cst_54 : f32 to vector<16x128xf32>
    %119 = arith.addf %117, %118 : vector<16x128xf32>
    %120 = arith.mulf %117, %119 : vector<16x128xf32>
    %cst_55 = arith.constant 2.000000e+00 : f32
    %121 = vector.broadcast %cst_55 : f32 to vector<16x128xf32>
    %122 = arith.addf %120, %121 : vector<16x128xf32>
    %123 = tpu.reciprocal %122 {approx = true} : vector<16x128xf32> -> vector<16x128xf32>
    %124 = arith.mulf %114, %120 : vector<16x128xf32>
    %125 = arith.mulf %124, %123 : vector<16x128xf32>
    %126 = arith.truncf %125 : vector<16x128xf32> to vector<16x128xbf16>
    %c6_56 = arith.constant 6 : index
    %c0_57 = arith.constant 0 : index
    %c0_58 = arith.constant 0 : index
    %127 = vector.load %arg3[%c6_56, %c0_57, %c0_58] : memref<7x128x128xbf16, #tpu.memory_space<vmem>>, vector<1x128x128xbf16>
    %128 = vector.shape_cast %127 : vector<1x128x128xbf16> to vector<128x128xbf16>
    %cst_59 = arith.constant dense<0.000000e+00> : vector<16x128xf32>
    %129 = tpu.matmul %126, %128, %cst_59 {dimension_numbers = #tpu.dot_dimension_numbers<[1], [0], [0], [1], [0, 0, 1, 1], [], []>} : vector<16x128xbf16>, vector<128x128xbf16>, vector<16x128xf32> -> vector<16x128xf32>
    %c7 = arith.constant 7 : index
    %c0_60 = arith.constant 0 : index
    %130 = vector.load %arg5[%c7, %c0_60] : memref<9x128xf32, #tpu.memory_space<vmem>>, vector<1x128xf32>
    %131 = vector.broadcast %130 : vector<1x128xf32> to vector<16x128xf32>
    %132 = arith.addf %129, %131 : vector<16x128xf32>
    %cst_61 = arith.constant 2.000000e+01 : f32
    %133 = vector.broadcast %cst_61 : f32 to vector<16x128xf32>
    %134 = arith.minimumf %132, %133 : vector<16x128xf32>
    %135 = math.exp %134 : vector<16x128xf32>
    %cst_62 = arith.constant 2.000000e+00 : f32
    %136 = vector.broadcast %cst_62 : f32 to vector<16x128xf32>
    %137 = arith.addf %135, %136 : vector<16x128xf32>
    %138 = arith.mulf %135, %137 : vector<16x128xf32>
    %cst_63 = arith.constant 2.000000e+00 : f32
    %139 = vector.broadcast %cst_63 : f32 to vector<16x128xf32>
    %140 = arith.addf %138, %139 : vector<16x128xf32>
    %141 = tpu.reciprocal %140 {approx = true} : vector<16x128xf32> -> vector<16x128xf32>
    %142 = arith.mulf %132, %138 : vector<16x128xf32>
    %143 = arith.mulf %142, %141 : vector<16x128xf32>
    %144 = arith.truncf %143 : vector<16x128xf32> to vector<16x128xbf16>
    %c0_64 = arith.constant 0 : index
    %c0_65 = arith.constant 0 : index
    %145 = vector.load %arg4[%c0_64, %c0_65] : memref<128x128xbf16, #tpu.memory_space<vmem>>, vector<128x128xbf16>
    %cst_66 = arith.constant dense<0.000000e+00> : vector<16x128xf32>
    %146 = tpu.matmul %144, %145, %cst_66 {dimension_numbers = #tpu.dot_dimension_numbers<[1], [0], [0], [1], [0, 0, 1, 1], [], []>} : vector<16x128xbf16>, vector<128x128xbf16>, vector<16x128xf32> -> vector<16x128xf32>
    %c8 = arith.constant 8 : index
    %c0_67 = arith.constant 0 : index
    %147 = vector.load %arg5[%c8, %c0_67] : memref<9x128xf32, #tpu.memory_space<vmem>>, vector<1x128xf32>
    %148 = vector.broadcast %147 : vector<1x128xf32> to vector<16x128xf32>
    %149 = arith.addf %146, %148 : vector<16x128xf32>
    %c0_68 = arith.constant 0 : index
    %c0_69 = arith.constant 0 : index
    %150 = vector.load %arg6[%c0_68, %c0_69] : memref<16x128xf32, #tpu.memory_space<vmem>>, vector<16x128xf32>
    tpu.vector_store %arg6[%c0_68, %c0_69], %149 {strides = array<i32>} : memref<16x128xf32, #tpu.memory_space<vmem>>, vector<16x128xf32>,
    return
  }
  func.func @transform_0(%arg0: i32) -> (i32, i32) {
    %c0_i32 = arith.constant 0 : i32
    %c0_i32_0 = arith.constant 0 : i32
    return %arg0, %c0_i32 : i32, i32
  }
  func.func @transform_1(%arg0: i32) -> (i32, i32) {
    %c0_i32 = arith.constant 0 : i32
    %c0_i32_0 = arith.constant 0 : i32
    %c0_i32_1 = arith.constant 0 : i32
    return %c0_i32, %c0_i32_0 : i32, i32
  }
  func.func @transform_2(%arg0: i32) -> (i32, i32, i32) {
    %c0_i32 = arith.constant 0 : i32
    %c0_i32_0 = arith.constant 0 : i32
    %c0_i32_1 = arith.constant 0 : i32
    %c0_i32_2 = arith.constant 0 : i32
    return %c0_i32, %c0_i32_0, %c0_i32_1 : i32, i32, i32
  }
  func.func @transform_3(%arg0: i32) -> (i32, i32) {
    %c0_i32 = arith.constant 0 : i32
    %c0_i32_0 = arith.constant 0 : i32
    %c0_i32_1 = arith.constant 0 : i32
    return %c0_i32, %c0_i32_0 : i32, i32
  }
  func.func @transform_4(%arg0: i32) -> (i32, i32) {
    %c0_i32 = arith.constant 0 : i32
    %c0_i32_0 = arith.constant 0 : i32
    %c0_i32_1 = arith.constant 0 : i32
    return %c0_i32, %c0_i32_0 : i32, i32
  }
  func.func @transform_5(%arg0: i32) -> (i32, i32) {
    %c0_i32 = arith.constant 0 : i32
    %c0_i32_0 = arith.constant 0 : i32
    return %arg0, %c0_i32 : i32, i32
  }
}

</mosaic_0001>

<bundles_post_ra>
// kernel: tpu_custom_call.1
= control target key start
LH: loop header
LB: loop body
LE: loop exit
PB: predicated region body
PF: predicated region fallthrough
CT: control target
= control target key end

     0   :  { %s3463_s0 = inlined_call_operand.hbm [shape: f32[24,784], index: 0, kind: input, shape index: {}]   ;;  %s3464_s1 = inlined_call_operand.hbm [shape: bf16[784,128], index: 1, kind: input, shape index: {}]   ;;  %s3465_s2 = inlined_call_operand.hbm [shape: bf16[7,128,128], index: 2, kind: input, shape index: {}]   ;;  %s3466_s3 = inlined_call_operand.hbm [shape: bf16[128,128], index: 3, kind: input, shape index: {}]   ;;  %s3467_s4 = inlined_call_operand.hbm [shape: f32[9,128], index: 4, kind: input, shape index: {}]   ;;  %s3468_s5 = inlined_call_operand.hbm [shape: f32[24,128], index: 5, kind: output, shape index: {}]  }
   0x1   :  { %3475 = sst [smem:[#allocation19_spill]] %s3464_s1 }
   0x2   :  { %10 = vsyncpa [#allocation3], 0 }
   0x3   :  { %12 = vsyncpa [#allocation3 + $0x1], 0 }
   0x4   :  { %13 = vsyncpa [#allocation6], 0 }
   0x5   :  { %14 = vsyncpa [#allocation9], 0 }
   0x6   :  { %15 = vsyncpa [#allocation4], 0 }
   0x7   :  { %17 = vsyncpa [#allocation4 + $0x1], 0  ;;  %s3069_s18 = smov 0   ;;  %s3071_s19 = smov 0  }
   0x8   :  { %s3073_s20 = smov 0   ;;  %s3075_s21 = smov 0  }
   0x9 LB: > { %s3090_s22 = sadd.s32 4294967295, %s3021_s21   ;;  %s2078_s23 = sadd.s32 4294967294, %s3021_s21   ;;  %s3021_s21 = sphi %s3075_s21, %s3497_s21   ;;  %s3017_s20 = sphi %s3073_s20, %s3501_s20   ;;  %s3013_s19 = sphi %s3071_s19, %s3500_s19   ;;  %s3009_s18 = sphi %s3069_s18, %s3499_s18  }
   0xa   : > { %s3094_s24 = sadd.s32 1, %s3021_s21   ;;  %s30_s25 = sadd.s32 1, %s3017_s20 }
   0xb   : > { %3476 = sst [smem:[#allocation16_spill]] %s3094_s24  ;;  %s27_s26 = ssub.s32 %s3021_s21, %s3094_s24 }
   0xc   : > { %p37_p0 = scmp.ne.s32.totalorder %s3017_s20, %s3013_s19  ;;  %p28_p1 = scmp.eq.s32.totalorder %s27_s26, 0 }
   0xd   : > { %p38_p2 = scmp.eq.s32.totalorder %s3021_s21, 0  ;;  %p43_p3 = scmp.ne.s32.totalorder %s3013_s19, %s3009_s18 }
   0xe   : > { %p3469_p4 = scmp.eq.s32.totalorder %s3090_s22, 0  ;;  %p151_p7 = scmp.eq.s32.totalorder %s3090_s22, 1 }
   0xf   : > { %s3106_s27 = scalar_select %p28_p1, %s3017_s20, %s30_s25  }
  0x10   : > { %p3108_p5 = por %p38_p2, %p37_p0  ;;  %p3114_p6 = por %p3469_p4, %p43_p3 }
  0x11   : > { %3477 = sst [smem:[#allocation17_spill]] %s3106_s27  ;;  %p157_p8 = scmp.eq.s32.totalorder %s2078_s23, 1 }
  0x12   : > { %s3478_s28 = scalar_select %p3108_p5, 1, 0 }
  0x13   : > { %s3479_s29 = scalar_select %p3114_p6, 1, 0 }
  0x14   : > { %p2079_p9 = scmp.ge.s32.totalorder %s3021_s21, 1  ;;  %p164_p10 = scmp.lt.s32.totalorder %s3021_s21, 3 }
  0x15   : > { %p3121_p11 = por %p151_p7, %p37_p0  ;;  %p3125_p12 = por %p157_p8, %p43_p3 }
  0x16   : > { %p3129_p13 = pnand %p2079_p9, %p164_p10  ;;  %s3023_s8 = smov [#allocation5]  }
  0x17   : > { %s3480_s30 = scalar_select %p3121_p11, 1, 0 }
  0x18   : > { %s3481_s6 = scalar_select %p3125_p12, 1, 0 }
  0x19   : > { %s3483_s7 = scalar_select %p3129_p13, 1, 0 }
  0x1a   : > { %3482 = sst [smem:[#allocation18_spill]] %s3481_s6  ;;  %p2558_p1 = pneg %p3129_p13 }
  0x1b   : > { %s176_s9 = sshll.u32 %s3023_s8, 4  ;;  %s3024_s11 = smov [#allocation8]   ;;  %s177_s9 = int_to_ptr.vmem [resolvable:$true] %s176_s9 }
  0x1c   : > { %p3137_p2 = pnand %p2558_p1, %p3469_p4  ;;  %s202_s12 = sshll.u32 %s3024_s11, 4  ;;  %s3141_s12 = int_to_ptr.vmem [resolvable:$true] %s202_s12 }
  0x1d   : > { %s3485_s1 = sld [smem:[#allocation19_spill]] }
  0x1e   : > { %p3151_p3 = pneg %p3137_p2 }
  0x23   : > { %s2807_s15 = scalar_lea.hbm %s3485_s1, 6272 }
  0x24   : > { %p2808_p0 = scmp.ne.s32.totalorder %s3485_s1, %s2807_s15  ;;  %p2814_p9 = scmp.lt.u32.totalorder %s2807_s15, %s3485_s1 }
  0x26   : > { %p2810_p7 = pnand %p3151_p3, %p2808_p0 }
  0x28   : > { %p2811_p8 = pneg %p2810_p7 }
  0x2a   : > { %p2816_p10 = pnand %p2814_p9, %p2811_p8 }
  0x2c   : > { %2819 = shalt.err (!%p2816_p10)
}
  0x2d   : > { %s2820_s8 = scalar_lea.vmem %s177_s9, 6272  ;;  %p2828_p11 = scmp.lt.s32.totalorder %s177_s9, %s177_s9 }
  0x2e   : > { %p2821_p1 = scmp.ne.s32.totalorder %s177_s9, %s2820_s8  ;;  %p2829_p6 = scmp.lt.s32.totalorder %s2820_s8, %s2820_s8 }
  0x30   : > { %p2823_p4 = pnand %p2821_p1, %p3151_p3  ;;  %p2830_p13 = por %p2829_p6, %p2828_p11 }
  0x32   : > { %p2824_p12 = pneg %p2823_p4 }
  0x34   : > { %p2831_p5 = pnand %p2830_p13, %p2824_p12 }
  0x36   : > { %2834 = shalt.err (!%p2831_p5)
}
  0x37   : > { %s3025_s11 = smov 64   ;;  %s3026_s13 = smov 4  }
  0x38   : > { %2561 = dma.hbm_to_vmem [thread:$0]  (!%p3137_p2), %s3485_s1, 6272, %s177_s9, [#allocation6], %s3025_s11, %s3025_s11, %s3026_s13  }
  0x39   : > { %s2835_s25 = scalar_lea.hbm %s3466_s3, 1024 }
  0x3a   : > { %p2836_p4 = scmp.ne.s32.totalorder %s3466_s3, %s2835_s25  ;;  %p2842_p11 = scmp.lt.u32.totalorder %s2835_s25, %s3466_s3 }
  0x3c   : > { %p2838_p5 = pnand %p2836_p4, %p3151_p3 }
  0x3e   : > { %p2839_p6 = pneg %p2838_p5 }
  0x40   : > { %p2844_p12 = pnand %p2842_p11, %p2839_p6 }
  0x42   : > { %2847 = shalt.err (!%p2844_p12)
}
  0x43   : > { %s2848_s9 = scalar_lea.vmem %s3141_s12, 1024  ;;  %p2856_p8 = scmp.lt.s32.totalorder %s3141_s12, %s3141_s12 }
  0x44   : > { %p2849_p13 = scmp.ne.s32.totalorder %s3141_s12, %s2848_s9  ;;  %p2857_p9 = scmp.lt.s32.totalorder %s2848_s9, %s2848_s9 }
  0x46   : > { %p2851_p0 = pnand %p2849_p13, %p3151_p3  ;;  %p2858_p10 = por %p2857_p9, %p2856_p8 }
  0x48   : > { %p2852_p7 = pneg %p2851_p0 }
  0x4a   : > { %p2859_p1 = pnand %p2858_p10, %p2852_p7 }
  0x4c   : > { %2862 = shalt.err (!%p2859_p1)
}
  0x4d   : > { %2567 = dma.hbm_to_vmem [thread:$0]  (!%p3137_p2), %s3466_s3, 1024, %s3141_s12, [#allocation9], %s3025_s11, %s3025_s11, %s3026_s13  }
  0x4e   : > { %s3027_s14 = smov [#allocation7]   ;;  %s3028_s16 = smov [#allocation10]  }
  0x4f   : > { %s189_s15 = sshll.u32 %s3027_s14, 4  ;;  %s215_s17 = sshll.u32 %s3028_s16, 4  ;;  %s190_s15 = int_to_ptr.vmem [resolvable:$true] %s189_s15  ;;  %s216_s17 = int_to_ptr.vmem [resolvable:$true] %s215_s17 }
  0x50   : > { %s2863_s8 = scalar_lea.hbm %s3465_s2, 7168 }
  0x51   : > { %p2864_p4 = scmp.ne.s32.totalorder %s3465_s2, %s2863_s8  ;;  %p2870_p11 = scmp.lt.u32.totalorder %s2863_s8, %s3465_s2 }
  0x53   : > { %p2866_p5 = pnand %p2864_p4, %p3151_p3 }
  0x55   : > { %p2867_p6 = pneg %p2866_p5 }
  0x57   : > { %p2872_p12 = pnand %p2870_p11, %p2867_p6 }
  0x59   : > { %2875 = shalt.err (!%p2872_p12)
}
  0x5a   : > { %s2876_s12 = scalar_lea.vmem %s190_s15, 7168  ;;  %p2884_p8 = scmp.lt.s32.totalorder %s190_s15, %s190_s15 }
  0x5b   : > { %p2877_p13 = scmp.ne.s32.totalorder %s190_s15, %s2876_s12  ;;  %p2885_p9 = scmp.lt.s32.totalorder %s2876_s12, %s2876_s12 }
  0x5d   : > { %p2879_p0 = pnand %p2877_p13, %p3151_p3  ;;  %p2886_p10 = por %p2885_p9, %p2884_p8 }
  0x5f   : > { %p2880_p7 = pneg %p2879_p0 }
  0x61   : > { %p2887_p1 = pnand %p2886_p10, %p2880_p7 }
  0x63   : > { %2890 = shalt.err (!%p2887_p1)
}
  0x64   : > { %2564 = dma.hbm_to_vmem [thread:$0]  (!%p3137_p2), %s3465_s2, 7168, %s190_s15, [#allocation6], %s3025_s11, %s3025_s11, %s3026_s13  }
  0x65   : > { %s2891_s16 = scalar_lea.hbm %s3467_s4, 256 }
  0x66   : > { %p2892_p4 = scmp.ne.s32.totalorder %s3467_s4, %s2891_s16  ;;  %p2898_p11 = scmp.lt.u32.totalorder %s2891_s16, %s3467_s4 }
  0x68   : > { %p2894_p5 = pnand %p2892_p4, %p3151_p3 }
  0x6a   : > { %p2895_p6 = pneg %p2894_p5 }
  0x6c   : > { %p2900_p12 = pnand %p2898_p11, %p2895_p6 }
  0x6e   : > { %2903 = shalt.err (!%p2900_p12)
}
  0x6f   : > { %s2904_s24 = scalar_lea.vmem %s216_s17, 256  ;;  %p2912_p8 = scmp.lt.s32.totalorder %s216_s17, %s216_s17 }
  0x70   : > { %p2905_p13 = scmp.ne.s32.totalorder %s216_s17, %s2904_s24  ;;  %p2913_p9 = scmp.lt.s32.totalorder %s2904_s24, %s2904_s24 }
  0x72   : > { %p2907_p0 = pnand %p2905_p13, %p3151_p3  ;;  %p2914_p10 = por %p2913_p9, %p2912_p8 }
  0x74   : > { %p2908_p7 = pneg %p2907_p0 }
  0x76   : > { %p2915_p1 = pnand %p2914_p10, %p2908_p7 }
  0x78   : > { %2918 = shalt.err (!%p2915_p1)
}
  0x79   : > { %s3029_s11 = smov 128   ;;  %s3030_s13 = smov 8  }
  0x7a   : > { %2570 = dma.hbm_to_vmem [thread:$0]  (!%p3137_p2), %s3467_s4, 256, %s216_s17, [#allocation9], %s3029_s11, %s3029_s11, %s3030_s13  }
  0x7b   : > { %p2084_p4 = scmp.ge.s32.totalorder %s3021_s21, 2 }
  0x7c   : > { %p3487_p3 = scmp.ne.s32.totalorder (!%p2084_p4), %s3478_s28, 0 }
  0x7d   : > { %225 = sbr.rel (%p2084_p4) target bundleno = 168 (0xa8), region = 32 }
  0x84   : > { %228 = sbr.rel (!%p3487_p3) target bundleno = 168 (0xa8), region = 36  ;;  %s229_s23 = sand.u32 (%p3487_p3), 1, %s3017_s20  }
  0x85   : > { %s2085_s1 = sshll.u32 (%p3487_p3), %s3021_s21, 1  ;;  %s2537_s6 = smul.u32 (%p3487_p3), 112, %s229_s23 }
  0x86   : > { %s235_s27 = ssub.s32 (%p3487_p3), 3, %s2085_s1  ;;  %s3245_s14 = scalar_lea.sflag (%p3487_p3), [#allocation3], %s229_s23 }
  0x87   : > { %p236_p5 = scmp.lt.s32.totalorder (%p3487_p3), %s235_s27, 2  ;;  %s233_s16 = scalar_lea.vmem (%p3487_p3), [#allocation2], %s2537_s6 }
  0x8b   : > { %s3503_s27 = smov (!%p236_p5, %s235_s27), 2 }
  0x8c   : > { %s3242_s10 = smul.u32 896, %s3503_s27 }
  0x8e   : > { %s241_s17 = ssub.s32 1792, %s3242_s10 }
  0x8f   : > { %242 = vsyncadd %s3245_s14, %s241_s17  ;;  %p2088_p2 = scmp.ne.s32.totalorder %s3242_s10, 0  ;;  %s2538_s28 = smul.u32 1792, %s3021_s21 }
  0x90   : > { %s248_s25 = sshll.u32 %s233_s16, 4  ;;  %s2923_s15 = scalar_lea.hbm %s3463_s0, 2688  ;;  %s3255_s25 = int_to_ptr.vmem [resolvable:$true] %s248_s25 }
  0x91   : > { %s3253_s9 = scalar_lea.hbm %s3463_s0, %s2538_s28 }
  0x92   : > { %s2919_s24 = scalar_lea.hbm %s3253_s9, %s3242_s10  ;;  %p2924_p13 = scmp.lt.u32.totalorder %s3253_s9, %s3463_s0 }
  0x93   : > { %p2920_p6 = scmp.ne.s32.totalorder %s3253_s9, %s2919_s24  ;;  %p2925_p0 = scmp.lt.u32.totalorder %s2923_s15, %s2919_s24 }
  0x94   : > { %p2927_p8 = scmp.lt.u32.totalorder %s2919_s24, %s3253_s9 }
  0x95   : > { %p2921_p11 = pnand %p2920_p6, %p2088_p2  ;;  %p2926_p7 = por %p2925_p0, %p2924_p13 }
  0x97   : > { %p2922_p12 = pneg %p2921_p11  ;;  %p2928_p9 = por %p2927_p8, %p2926_p7 }
  0x99   : > { %p2929_p10 = pnand %p2928_p9, %p2922_p12 }
  0x9b   : > { %2932 = shalt.err (!%p2929_p10)
}
  0x9c   : > { %s2933_s1 = scalar_lea.vmem %s3255_s25, %s3242_s10  ;;  %s3031_s6 = smov [#allocation2]  }
  0x9d   : > { %p2934_p1 = scmp.ne.s32.totalorder %s3255_s25, %s2933_s1  ;;  %s2937_s27 = sshll.u32 %s3031_s6, 4  ;;  %s2938_s27 = int_to_ptr.vmem [resolvable:$false] %s2937_s27 }
  0x9e   : > { %s2939_s17 = scalar_lea.vmem %s2938_s27, 3584  ;;  %p2940_p6 = scmp.lt.s32.totalorder %s3255_s25, %s2938_s27 }
  0x9f   : > { %p2935_p3 = pnand %p2934_p1, %p2088_p2  ;;  %p2941_p11 = scmp.lt.s32.totalorder %s2939_s17, %s2933_s1 }
  0xa1   : > { %p2936_p5 = pneg %p2935_p3  ;;  %p2942_p13 = por %p2941_p11, %p2940_p6 }
  0xa3   : > { %p2943_p0 = pnand %p2942_p13, %p2936_p5 }
  0xa5   : > { %2946 = shalt.err (!%p2943_p0)
}
  0xa6   : > { %s3032_s16 = smov 896   ;;  %s3033_s28 = smov 56  }
  0xa7   : > { %254 = dma.hbm_to_vmem [thread:$0]  (%p2088_p2), %s3253_s9, %s3242_s10, %s3255_s25, %s3245_s14, %s3032_s16, %s3032_s16, %s3033_s28  }
  0xa8 PF: > { %p3488_p12 = scmp.ne.s32.totalorder %s3483_s7, 0 }
  0xa9   : > { %s3285_s26 = sand.u32 (!%p3488_p12), 1, %s3013_s19   ;;  %p3489_p7 = scmp.ne.s32.totalorder (!%p3488_p12), %s3479_s29, 0 }
  0xaa   : > { %260 = sbr.rel (%p3488_p12) target bundleno = 2515 (0x9d3), region = 40  ;;  %s263_s24 = scalar_lea.sflag (!%p3488_p12), [#allocation3], %s3285_s26 }
  0xab   : > { %s2539_s8 = smul.u32 (!%p3488_p12), 112, %s3285_s26 }
  0xad   : > { %s3289_s11 = scalar_lea.vmem (!%p3488_p12), [#allocation2], %s2539_s8 }
  0xb1   : > { %2992 = dma.done.wait (%p3489_p7), %s263_s24, 1792  }
  0xb2   : > { %2994 = vsyncadd (%p3489_p7), %s263_s24, 4294965504  ;;  %p3490_p2 = scmp.eq.s32.totalorder %s3090_s22, 0 }
  0xb4   : > { %2996 = dma.done.wait (%p3490_p2), [#allocation6], 13440   ;;  %p3491_p8 = pmov %p3490_p2 }
  0xb5   : > { %p3492_p9 = pmov %p3490_p2 }
  0xb6   : > { %2998 = vsyncadd (%p3491_p8), [#allocation6], 4294953856 }
  0xb7   : > { %3000 = dma.done.wait (%p3492_p9), [#allocation9], 1280   ;;  %p3493_p10 = pmov %p3490_p2 }
  0xb8   : > { %v2630_v0 = vld [vmem:[#allocation5 + $0x40] sm:$0xff]   ;;  %v2634_v4 = vld [vmem:[#allocation5 + $0x48] sm:$0xff]   ;;  %v2638_v8 = vld [vmem:[#allocation5 + $0x50] sm:$0xff]   ;;  %v3034_v43 = vmov 0.0   ;;  %vm3035_vm0 = vmmov 0   ;;  %vm739_vm1 = vcmask 130048  }
  0xb9   : > { %3002 = vsyncadd (%p3493_p10), [#allocation9], 4294966016  ;;  %v2631_v1 = vld [vmem:[#allocation5] sm:$0xff]   ;;  %2231 = vmatprep.subr.bf16.mxu0 %v2630_v0  ;;  %v2635_v5 = vld [vmem:[#allocation5 + $0x8] sm:$0xff]   ;;  %s2097_s29 = sshll.u32 %s3285_s26, 4  ;;  %s1948_s10 = scalar_lea.sflag [#allocation4], %s3285_s26 }
  0xba   : > { %v2632_v2 = vld [vmem:[#allocation5 + $0xc0] sm:$0xff]   ;;  %2232 = vmatpush3.bf16.msra.mxu0 %v2631_v1  ;;  %v2636_v6 = vld [vmem:[#allocation5 + $0xc8] sm:$0xff]   ;;  %v2639_v9 = vld [vmem:[#allocation5 + $0x10] sm:$0xff]   ;;  %s308_s7 = scalar_lea.vmem [#allocation11], %s2097_s29  ;;  %p3494_p1 = scmp.ne.s32.totalorder %s3480_s30, 0 }
  0xbb   : > { %v2633_v3 = vld [vmem:[#allocation5 + $0x80] sm:$0xff]   ;;  %2253 = vmatprep.subr.bf16.mxu1 %v2632_v2  ;;  %2233 = vmatprep.subr.bf16.mxu0 %v2634_v4  ;;  %v2637_v7 = vld [vmem:[#allocation5 + $0x88] sm:$0xff]   ;;  %v2640_v10 = vld [vmem:[#allocation5 + $0xd0] sm:$0xff]   ;;  %s2222_s14 = sshll.u32 (%p3494_p1), %s3090_s22, 1 }
  0xbc   : > { %2254 = vmatpush3.bf16.msra.mxu1 %v2633_v3  ;;  %v2641_v11 = vld [vmem:[#allocation5 + $0x90] sm:$0xff]   ;;  %v2642_v12 = vld [vmem:[#allocation5 + $0x58] sm:$0xff]   ;;  %v2646_v16 = vld [vmem:[#allocation5 + $0x60] sm:$0xff]   ;;  %s1956_s25 = ssub.s32 (%p3494_p1), 3, %s2222_s14 }
  0xbd   : > { %2255 = vmatprep.subr.bf16.mxu1 %v2636_v6  ;;  %v2643_v13 = vld [vmem:[#allocation5 + $0x18] sm:$0xff]   ;;  %v2647_v17 = vld [vmem:[#allocation5 + $0x20] sm:$0xff]   ;;  %v2650_v20 = vld [vmem:[#allocation5 + $0x68] sm:$0xff]   ;;  %p1957_p3 = scmp.lt.s32.totalorder (%p3494_p1), %s1956_s25, 2 }
  0xbe   : > { %2234 = vmatpush3.bf16.msra.mxu0 %v2635_v5  ;;  %v2644_v14 = vld [vmem:[#allocation5 + $0xd8] sm:$0xff]   ;;  %v2648_v18 = vld [vmem:[#allocation5 + $0xe0] sm:$0xff]   ;;  %v2651_v21 = vld [vmem:[#allocation5 + $0x28] sm:$0xff]  }
  0xbf   : > { %2235 = vmatprep.subr.bf16.mxu0 %v2638_v8  ;;  %v2645_v15 = vld [vmem:[#allocation5 + $0x98] sm:$0xff]   ;;  %v2649_v19 = vld [vmem:[#allocation5 + $0xa0] sm:$0xff]   ;;  %v2652_v22 = vld [vmem:[#allocation5 + $0xe8] sm:$0xff]  }
  0xc0   : > { %2256 = vmatpush3.bf16.msra.mxu1 %v2637_v7  ;;  %v2653_v23 = vld [vmem:[#allocation5 + $0xa8] sm:$0xff]   ;;  %v2654_v24 = vld [vmem:[#allocation5 + $0x70] sm:$0xff]   ;;  %v2658_v28 = vld [vmem:[#allocation5 + $0x78] sm:$0xff]  }
  0xc1   : > { %2257 = vmatprep.subr.bf16.mxu1 %v2640_v10  ;;  %v2655_v25 = vld [vmem:[#allocation5 + $0x30] sm:$0xff]   ;;  %v2659_v29 = vld [vmem:[#allocation5 + $0x38] sm:$0xff]   ;;  %v2662_v38 = vld [vmem:[#allocation5 + $0x140] sm:$0xff]  }
  0xc2   : > { %2236 = vmatpush3.bf16.msra.mxu0 %v2639_v9  ;;  %v2656_v26 = vld [vmem:[#allocation5 + $0xf0] sm:$0xff]   ;;  %v2660_v30 = vld [vmem:[#allocation5 + $0xf8] sm:$0xff]   ;;  %v2663_v42 = vld [vmem:[#allocation5 + $0x100] sm:$0xff]  }
  0xc3   : > { %2237 = vmatprep.subr.bf16.mxu0 %v2642_v12  ;;  %v2657_v27 = vld [vmem:[#allocation5 + $0xb0] sm:$0xff]   ;;  %v322_v31 = vld [vmem:[%s3289_s11 + $0x8] sm:$0xff]  ;;  %v328_v36 = vld [vmem:[%s3289_s11 + $0x38] sm:$0xff] }
  0xc4   : > { %2258 = vmatpush3.bf16.msra.mxu1 %v2641_v11  ;;  %v329_v32 = vld [vmem:[%s3289_s11 + $0x40] sm:$0xff]  ;;  %v2661_v34 = vld [vmem:[#allocation5 + $0xb8] sm:$0xff]   ;;  %v331_v40 = vld [vmem:[%s3289_s11 + $0x50] sm:$0xff] }
  0xc5   : > { %2259 = vmatprep.subr.bf16.mxu1 %v2644_v14  ;;  %v336_v33 = vpack.c.bf16 %v329_v32, %v322_v31  ;;  %v321_v35 = vld [vmem:[%s3289_s11] sm:$0xff]  ;;  %v324_v39 = vld [vmem:[%s3289_s11 + $0x18] sm:$0xff]  ;;  %v323_v44 = vld [vmem:[%s3289_s11 + $0x10] sm:$0xff] }
  0xc6   : > { %2238 = vmatpush3.bf16.msra.mxu0 %v2643_v13  ;;  %v335_v37 = vpack.c.bf16 %v328_v36, %v321_v35  ;;  %v338_v41 = vpack.c.bf16 %v331_v40, %v324_v39  ;;  %v330_v45 = vld [vmem:[%s3289_s11 + $0x48] sm:$0xff]  ;;  %v2666_v49 = vld [vmem:[#allocation5 + $0x150] sm:$0xff]   ;;  %v2670_v53 = vld [vmem:[#allocation5 + $0x160] sm:$0xff]  }
  0xc7   : > { %2239 = vmatprep.subr.bf16.mxu0 %v2646_v16  ;;  %775 = vmatprep.mubr.bf16.mxu0 %v336_v33  ;;  %v337_v46 = vpack.c.bf16 %v330_v45, %v323_v44  ;;  %v2664_v47 = vld [vmem:[#allocation5 + $0x148] sm:$0xff]   ;;  %v2667_v50 = vld [vmem:[#allocation5 + $0x110] sm:$0xff]   ;;  %v2668_v51 = vld [vmem:[#allocation5 + $0x158] sm:$0xff]  }
  0xc8   : > { %2260 = vmatpush3.bf16.msra.mxu1 %v2645_v15  ;;  %816 = vmatprep.mubr.bf16.mxu1 %v338_v41  ;;  %v2665_v48 = vld [vmem:[#allocation5 + $0x108] sm:$0xff]   ;;  %v2669_v52 = vld [vmem:[#allocation5 + $0x118] sm:$0xff]   ;;  %v2671_v54 = vld [vmem:[#allocation5 + $0x120] sm:$0xff]  }
  0xc9   : > { %2261 = vmatprep.subr.bf16.mxu1 %v2648_v18  ;;  %v2672_v55 = vld [vmem:[#allocation5 + $0x168] sm:$0xff]   ;;  %v2678_v56 = vld [vmem:[#allocation5 + $0x180] sm:$0xff]   ;;  %v2674_v59 = vld [vmem:[#allocation5 + $0x170] sm:$0xff]  }
  0xca   : > { %2240 = vmatpush3.bf16.msra.mxu0 %v2647_v17  ;;  %v326_v57 = vld [vmem:[%s3289_s11 + $0x28] sm:$0xff]  ;;  %v333_v60 = vld [vmem:[%s3289_s11 + $0x60] sm:$0xff]  ;;  %v327_v62 = vld [vmem:[%s3289_s11 + $0x30] sm:$0xff] }
  0xcb   : > { %2241 = vmatprep.subr.bf16.mxu0 %v2650_v20  ;;  %v2673_v58 = vld [vmem:[#allocation5 + $0x128] sm:$0xff]   ;;  %v340_v61 = vpack.c.bf16 %v333_v60, %v326_v57  ;;  %v2675_v1 = vld [vmem:[#allocation5 + $0x130] sm:$0xff]   ;;  %v2676_v2 = vld [vmem:[#allocation5 + $0x178] sm:$0xff]  }
  0xcc   : > { %2262 = vmatpush3.bf16.msra.mxu1 %v2649_v19  ;;  %v334_v63 = vld [vmem:[%s3289_s11 + $0x68] sm:$0xff]  ;;  %v325_v4 = vld [vmem:[%s3289_s11 + $0x20] sm:$0xff]  ;;  %v332_v5 = vld [vmem:[%s3289_s11 + $0x58] sm:$0xff] }
  0xcd   : > { %2263 = vmatprep.subr.bf16.mxu1 %v2652_v22  ;;  %v341_v0 = vpack.c.bf16 %v334_v63, %v327_v62  ;;  %v2677_v3 = vld [vmem:[#allocation5 + $0x138] sm:$0xff]   ;;  %v339_v6 = vpack.c.bf16 %v332_v5, %v325_v4  ;;  %v2679_v7 = vld [vmem:[#allocation7] sm:$0xff]   ;;  %v2680_v8 = vld [vmem:[#allocation7 + $0x8] sm:$0xff]  }
  0xce   : > { %2242 = vmatpush3.bf16.msra.mxu0 %v2651_v21  ;;  %v2681_v9 = vld [vmem:[#allocation7 + $0x10] sm:$0xff]   ;;  %v2682_v10 = vld [vmem:[#allocation7 + $0x18] sm:$0xff]   ;;  %v2683_v11 = vld [vmem:[#allocation7 + $0x20] sm:$0xff]  }
  0xcf   : > { %2243 = vmatprep.subr.bf16.mxu0 %v2654_v24  ;;  %v2684_v12 = vld [vmem:[#allocation7 + $0x28] sm:$0xff]   ;;  %v2685_v13 = vld [vmem:[#allocation7 + $0x30] sm:$0xff]   ;;  %v2686_v14 = vld [vmem:[#allocation7 + $0x38] sm:$0xff]  }
  0xd0   : > { %2264 = vmatpush3.bf16.msra.mxu1 %v2653_v23  ;;  %v2098_v16 = vld [vmem:[#allocation10] ss:$0 sm:$0xff]  ;;  %v2689_v4 = vld [vmem:[#allocation7 + $0x50] sm:$0xff]   ;;  %v2690_v5 = vld [vmem:[#allocation7 + $0x58] sm:$0xff]  }
  0xd1   : > { %2265 = vmatprep.subr.bf16.mxu1 %v2656_v26 }
  0xd2   : > { %2244 = vmatpush3.bf16.msra.mxu0 %v2655_v25 }
  0xd3   : > { %2245 = vmatprep.subr.bf16.mxu0 %v2658_v28 }
  0xd4   : > { %2266 = vmatpush3.bf16.msra.mxu1 %v2657_v27 }
  0xd5   : > { %2267 = vmatprep.subr.bf16.mxu1 %v2660_v30 }
  0xd6   : > { %2246 = vmatpush3.bf16.msra.mxu0 %v2659_v29 }
  0xd7   : > { %2275 = vmatprep.subr.bf16.mxu0 %v2662_v38 }
  0xd8   : > { %2268 = vmatpush3.bf16.msra.mxu1 %v2661_v34 }
  0xd9   : > { %2371 = vmatprep.subr.bf16.mxu1 %v3034_v43  ;;  %776 = vmatmul.mubr.bf16.vlgmr.msra.gmra.mrb[0].mxu0 %v335_v37 }
  0xda   : > { %2276 = vmatpush3.bf16.msra.mxu0 %v2663_v42  ;;  %857 = vmatprep.mubr.bf16.mxu0 %v340_v61 }
  0xdb   : > { %817 = vmatmul.mubr.bf16.vlgmr.msra.gmra.mrb[0].mxu1 %v337_v46  ;;  %2277 = vmatprep.subr.bf16.mxu0 %v2664_v47 }
  0xdc   : > { %2373 = vmatprep.mubr.msk.bf16.mxu1 %vm3035_vm0, %v3034_v43  ;;  %2372 = vmatpush3.bf16.msra.mxu1 %v2678_v56 }
  0xdd   : > { %2377 = vmatprep.subr.bf16.mxu1 %v3034_v43 }
  0xde   : > { %2278 = vmatpush3.bf16.msra.mxu0 %v2665_v48 }
  0xdf   : > { %2279 = vmatprep.subr.bf16.mxu0 %v2666_v49 }
  0xe2   : > { %2280 = vmatpush3.bf16.msra.mxu0 %v2667_v50 }
  0xe3   : > { %2281 = vmatprep.subr.bf16.mxu0 %v2668_v51  ;;  %2374 = vmatmul.mubr.msk.bf16.vlgmr.msra.gmra.mrb[4].mxu1 %vm739_vm1, %v341_v0 }
  0xe4   : > { %2393 = vmatprep.mubr.msk.bf16.mxu1 %vm3035_vm0, %v3034_v43  ;;  %2378 = vmatpush3.bf16.msra.mxu1 %v2679_v7  ;;  %v2692_v7 = vld [vmem:[#allocation7 + $0x68] sm:$0xff]  }
  0xe5   : > { %2379 = vmatprep.subr.bf16.mxu1 %v3034_v43 }
  0xe6   : > { %2282 = vmatpush3.bf16.msra.mxu0 %v2669_v52 }
  0xe7   : > { %2283 = vmatprep.subr.bf16.mxu0 %v2670_v53 }
  0xe8   : > { %2380 = vmatpush3.bf16.msra.mxu1 %v2680_v8  ;;  %v2693_v8 = vld [vmem:[#allocation7 + $0x70] sm:$0xff]  }
  0xe9   : > { %2381 = vmatprep.subr.bf16.mxu1 %v3034_v43 }
  0xea   : > { %2284 = vmatpush3.bf16.msra.mxu0 %v2671_v54 }
  0xeb   : > { %2285 = vmatprep.subr.bf16.mxu0 %v2672_v55 }
  0xec   : > { %2382 = vmatpush3.bf16.msra.mxu1 %v2681_v9  ;;  %v2694_v9 = vld [vmem:[#allocation7 + $0x78] sm:$0xff]  }
  0xed   : > { %2383 = vmatprep.subr.bf16.mxu1 %v3034_v43 }
  0xee   : > { %2286 = vmatpush3.bf16.msra.mxu0 %v2673_v58 }
  0xef   : > { %2287 = vmatprep.subr.bf16.mxu0 %v2674_v59 }
  0xf0   : > { %2384 = vmatpush3.bf16.msra.mxu1 %v2682_v10  ;;  %v2149_v10 = vld [vmem:[#allocation10 + $0x1] ss:$0 sm:$0xff] }
  0xf1   : > { %2385 = vmatprep.subr.bf16.mxu1 %v3034_v43 }
  0xf2   : > { %2288 = vmatpush3.bf16.msra.mxu0 %v2675_v1 }
  0xf3   : > { %2289 = vmatprep.subr.bf16.mxu0 %v2676_v2  ;;  %v2687_v2 = vld [vmem:[#allocation7 + $0x40] sm:$0xff]  }
  0xf4   : > { %2386 = vmatpush3.bf16.msra.mxu1 %v2683_v11 }
  0xf5   : > { %2387 = vmatprep.subr.bf16.mxu1 %v3034_v43 }
  0xf6   : > { %2290 = vmatpush3.bf16.msra.mxu0 %v2677_v3  ;;  %v2688_v3 = vld [vmem:[#allocation7 + $0x48] sm:$0xff]  }
  0xf7   : > { %2397 = vmatprep.subr.bf16.mxu0 %v3034_v43 }
  0xf8   : > { %2388 = vmatpush3.bf16.msra.mxu1 %v2684_v12 }
  0xf9   : > { %858 = vmatmul.mubr.bf16.vlgmr.msra.gmra.mrb[4].mxu0 %v339_v6  ;;  %2389 = vmatprep.subr.bf16.mxu1 %v3034_v43  ;;  %v2691_v6 = vld [vmem:[#allocation7 + $0x60] sm:$0xff]  }
  0xfa   : > { %2413 = vmatprep.mubr.msk.bf16.mxu0 %vm3035_vm0, %v3034_v43  ;;  %2398 = vmatpush3.bf16.msra.mxu0 %v2687_v2 }
  0xfb   : > { %2399 = vmatprep.subr.bf16.mxu0 %v3034_v43 }
  0xfc   : > { %2390 = vmatpush3.bf16.msra.mxu1 %v2685_v13 }
  0xfd   : > { %2391 = vmatprep.subr.bf16.mxu1 %v3034_v43 }
  0xfe   : > { %2400 = vmatpush3.bf16.msra.mxu0 %v2688_v3 }
  0xff   : > { %2401 = vmatprep.subr.bf16.mxu0 %v3034_v43 }
 0x100   : > { %2392 = vmatpush3.bf16.msra.mxu1 %v2686_v14 }
 0x101   : > { %2417 = vmatprep.subr.bf16.mxu1 %v3034_v43 }
 0x102   : > { %2402 = vmatpush3.bf16.msra.mxu0 %v2689_v4 }
 0x103   : > { %2403 = vmatprep.subr.bf16.mxu0 %v3034_v43 }
 0x106   : > { %2404 = vmatpush3.bf16.msra.mxu0 %v2690_v5 }
 0x107   : > { %2405 = vmatprep.subr.bf16.mxu0 %v3034_v43 }
 0x10a   : > { %2406 = vmatpush3.bf16.msra.mxu0 %v2691_v6 }
 0x10b   : > { %2407 = vmatprep.subr.bf16.mxu0 %v3034_v43 }
 0x10e   : > { %2408 = vmatpush3.bf16.msra.mxu0 %v2692_v7  ;;  %v2703_v7 = vld [vmem:[#allocation7 + $0xc0] sm:$0xff]  }
 0x10f   : > { %2409 = vmatprep.subr.bf16.mxu0 %v3034_v43 }
 0x112   : > { %2410 = vmatpush3.bf16.msra.mxu0 %v2693_v8  ;;  %v2704_v8 = vld [vmem:[#allocation7 + $0xc8] sm:$0xff]  }
 0x113   : > { %2411 = vmatprep.subr.bf16.mxu0 %v3034_v43 }
 0x116   : > { %2412 = vmatpush3.bf16.msra.mxu0 %v2694_v9  ;;  %v2705_v9 = vld [vmem:[#allocation7 + $0xd0] sm:$0xff]  }
 0x117   : > { %2437 = vmatprep.subr.bf16.mxu0 %v3034_v43 }
 0x1ac   : > { %v2247_v15 = vpop.f32.mrb[0].mxu0 }
 0x1ad   : > { %v2248_v17 = vpop.f32.mrb[1].mxu0 }
 0x1ae   : > { %v2249_v18 = vadd.f32 %v2248_v17, %v2247_v15  ;;  %v2250_v19 = vpop.f32.mrb[2].mxu0  ;;  %v2269_v20 = vpop.f32.mrb[0].mxu1 }
 0x1af   : > { %v2251_v21 = vpop.f32.mrb[3].mxu0  ;;  %v2270_v24 = vpop.f32.mrb[1].mxu1 }
 0x1b0   : > { %v778_v22 = vadd.f32 %v2249_v18, %v2098_v16  ;;  %v2252_v23 = vadd.f32 %v2251_v21, %v2250_v19  ;;  %v2271_v25 = vadd.f32 %v2270_v24, %v2269_v20  ;;  %v2272_v26 = vpop.f32.mrb[2].mxu1 }
 0x1b1   : > { %v2273_v28 = vpop.f32.mrb[3].mxu1 }
 0x1b2   : > { %v781_v27 = vadd.f32 %v2252_v23, %v2098_v16  ;;  %v819_v29 = vadd.f32 %v2271_v25, %v778_v22  ;;  %v2274_v30 = vadd.f32 %v2273_v28, %v2272_v26 }
 0x1b4   : > { %v822_v31 = vadd.f32 %v2274_v30, %v781_v27 }
 0x1b6   : > { %v900_v32 = vpop.f32.mrb[4].mxu1 }
 0x1b7   : > { %v2375_v33 = vpop.f32.mrb[5].mxu1 }
 0x1b8   : > { %v903_v34 = vpop.f32.mrb[6].mxu1 }
 0x1b9   : > { %v2376_v35 = vpop.f32.mrb[7].mxu1 }
 0x1cc   : > { %v2291_v36 = vpop.f32.mrb[4].mxu0 }
 0x1cd   : > { %v2292_v37 = vpop.f32.mrb[5].mxu0 }
 0x1ce   : > { %v2293_v38 = vadd.f32 %v2292_v37, %v2291_v36  ;;  %v2294_v39 = vpop.f32.mrb[6].mxu0  ;;  %v2695_v36 = vld [vmem:[#allocation7 + $0x80] sm:$0xff]   ;;  %v2696_v37 = vld [vmem:[#allocation7 + $0x88] sm:$0xff]  }
 0x1cf   : > { %v2295_v40 = vpop.f32.mrb[7].mxu0 }
 0x1d0   : > { %v860_v41 = vadd.f32 %v2293_v38, %v819_v29  ;;  %v2296_v42 = vadd.f32 %v2295_v40, %v2294_v39  ;;  %v2697_v38 = vld [vmem:[#allocation7 + $0x90] sm:$0xff]   ;;  %v2698_v39 = vld [vmem:[#allocation7 + $0x98] sm:$0xff]   ;;  %v2699_v40 = vld [vmem:[#allocation7 + $0xa0] sm:$0xff]  }
 0x1d2   : > { %v901_v44 = vadd.f32 %v900_v32, %v860_v41  ;;  %v863_v45 = vadd.f32 %v2296_v42, %v822_v31  ;;  %v2700_v41 = vld [vmem:[#allocation7 + $0xa8] sm:$0xff]   ;;  %v2701_v42 = vld [vmem:[#allocation7 + $0xb0] sm:$0xff]  }
 0x1d4   : > { %v907_v46 = vmin.f32 %v901_v44, 20.0  ;;  %v904_v47 = vadd.f32 %v903_v34, %v863_v45  ;;  %v2158_v45 = vld [vmem:[#allocation10 + $0x2] ss:$0 sm:$0xff] }
 0x1d6   : > { %v909_v48 = vmul.f32 1.442695, %v907_v46  ;;  %v908_v49 = vmin.f32 %v904_v47, 20.0 }
 0x1d8   : > { %2743 = vpow2.f32 %v909_v48  ;;  %v911_v50 = vmul.f32 1.442695, %v908_v49 }
 0x1da   : > { %2745 = vpow2.f32 %v911_v50 }
 0x1e2   : > { %v2744_v51 = vpop.eup %2743 }
 0x1e3   : > { %v913_v52 = vadd.f32 2.0, %v2744_v51 }
 0x1e4   : > { %v2746_v53 = vpop.eup %2745 }
 0x1e5   : > { %v915_v54 = vmul.f32 %v2744_v51, %v913_v52  ;;  %v914_v55 = vadd.f32 2.0, %v2746_v53 }
 0x1e7   : > { %v917_v56 = vadd.f32 2.0, %v915_v54  ;;  %v916_v57 = vmul.f32 %v2746_v53, %v914_v55  ;;  %v921_v60 = vmul.f32 %v915_v54, %v901_v44  ;;  %v2702_v44 = vld [vmem:[#allocation7 + $0xb8] sm:$0xff]  }
 0x1e9   : > { %2747 = vrcp.f32 %v917_v56  ;;  %v918_v58 = vadd.f32 2.0, %v916_v57  ;;  %v922_v61 = vmul.f32 %v916_v57, %v904_v47 }
 0x1eb   : > { %2749 = vrcp.f32 %v918_v58 }
 0x1f3   : > { %v2748_v59 = vpop.eup %2747 }
 0x1f4   : > { %v923_v63 = vmul.f32 %v2748_v59, %v921_v60 }
 0x1f5   : > { %v2750_v62 = vpop.eup %2749 }
 0x1f6   : > { %v924_v0 = vmul.f32 %v2750_v62, %v922_v61 }
 0x1f8   : > { %v925_v1 = vpack.c.bf16 %v924_v0, %v923_v63 }
 0x1fa   : > { %2394 = vmatmul.mubr.bf16.vlgmr.msra.gmra.mrb[8].mxu1 %v925_v1 }
 0x1fb   : > { %2433 = vmatprep.mubr.msk.bf16.mxu1 %vm3035_vm0, %v3034_v43  ;;  %2418 = vmatpush3.bf16.msra.mxu1 %v2695_v36 }
 0x1fc   : > { %2419 = vmatprep.subr.bf16.mxu1 %v3034_v43 }
 0x1ff   : > { %2420 = vmatpush3.bf16.msra.mxu1 %v2696_v37 }
 0x200   : > { %2421 = vmatprep.subr.bf16.mxu1 %v3034_v43 }
 0x203   : > { %2422 = vmatpush3.bf16.msra.mxu1 %v2697_v38 }
 0x204   : > { %2423 = vmatprep.subr.bf16.mxu1 %v3034_v43 }
 0x207   : > { %2424 = vmatpush3.bf16.msra.mxu1 %v2698_v39 }
 0x208   : > { %2425 = vmatprep.subr.bf16.mxu1 %v3034_v43 }
 0x20b   : > { %2426 = vmatpush3.bf16.msra.mxu1 %v2699_v40 }
 0x20c   : > { %2427 = vmatprep.subr.bf16.mxu1 %v3034_v43 }
 0x20f   : > { %2428 = vmatpush3.bf16.msra.mxu1 %v2700_v41  ;;  %v2711_v41 = vld [vmem:[#allocation7 + $0x100] sm:$0xff]  }
 0x210   : > { %2429 = vmatprep.subr.bf16.mxu1 %v3034_v43 }
 0x213   : > { %2430 = vmatpush3.bf16.msra.mxu1 %v2701_v42  ;;  %v2712_v42 = vld [vmem:[#allocation7 + $0x108] sm:$0xff]  }
 0x214   : > { %2431 = vmatprep.subr.bf16.mxu1 %v3034_v43 }
 0x217   : > { %2432 = vmatpush3.bf16.msra.mxu1 %v2702_v44  ;;  %v2713_v44 = vld [vmem:[#allocation7 + $0x110] sm:$0xff]  }
 0x218   : > { %2457 = vmatprep.subr.bf16.mxu1 %v3034_v43 }
 0x2cd   : > { %v1029_v11 = vpop.f32.mrb[8].mxu1 }
 0x2ce   : > { %v1030_v12 = vadd.f32 %v2149_v10, %v1029_v11  ;;  %v2395_v13 = vpop.f32.mrb[9].mxu1  ;;  %v2707_v11 = vld [vmem:[#allocation7 + $0xe0] sm:$0xff]  }
 0x2cf   : > { %v1032_v14 = vpop.f32.mrb[10].mxu1  ;;  %v2709_v13 = vld [vmem:[#allocation7 + $0xf0] sm:$0xff]  }
 0x2d0   : > { %v1036_v15 = vmin.f32 %v1030_v12, 20.0  ;;  %v1033_v16 = vadd.f32 %v2149_v10, %v1032_v14  ;;  %v2396_v17 = vpop.f32.mrb[11].mxu1  ;;  %v2706_v10 = vld [vmem:[#allocation7 + $0xd8] sm:$0xff]  }
 0x2d1   : > { %v2710_v14 = vld [vmem:[#allocation7 + $0xf8] sm:$0xff]  }
 0x2d2   : > { %v1038_v18 = vmul.f32 1.442695, %v1036_v15  ;;  %v1037_v19 = vmin.f32 %v1033_v16, 20.0  ;;  %v2167_v15 = vld [vmem:[#allocation10 + $0x3] ss:$0 sm:$0xff] }
 0x2d4   : > { %2751 = vpow2.f32 %v1038_v18  ;;  %v1040_v20 = vmul.f32 1.442695, %v1037_v19 }
 0x2d6   : > { %2753 = vpow2.f32 %v1040_v20 }
 0x2de   : > { %v2752_v21 = vpop.eup %2751 }
 0x2df   : > { %v1042_v22 = vadd.f32 2.0, %v2752_v21 }
 0x2e0   : > { %v2754_v23 = vpop.eup %2753 }
 0x2e1   : > { %v1044_v24 = vmul.f32 %v2752_v21, %v1042_v22  ;;  %v1043_v25 = vadd.f32 2.0, %v2754_v23 }
 0x2e3   : > { %v1046_v26 = vadd.f32 2.0, %v1044_v24  ;;  %v1045_v27 = vmul.f32 %v2754_v23, %v1043_v25  ;;  %v1050_v30 = vmul.f32 %v1044_v24, %v1030_v12  ;;  %v2708_v12 = vld [vmem:[#allocation7 + $0xe8] sm:$0xff]  }
 0x2e5   : > { %2755 = vrcp.f32 %v1046_v26  ;;  %v1047_v28 = vadd.f32 2.0, %v1045_v27  ;;  %v1051_v31 = vmul.f32 %v1045_v27, %v1033_v16 }
 0x2e7   : > { %2757 = vrcp.f32 %v1047_v28 }
 0x2ef   : > { %v2756_v29 = vpop.eup %2755 }
 0x2f0   : > { %v1052_v33 = vmul.f32 %v2756_v29, %v1050_v30 }
 0x2f1   : > { %v2758_v32 = vpop.eup %2757 }
 0x2f2   : > { %v1053_v34 = vmul.f32 %v2758_v32, %v1051_v31 }
 0x2f4   : > { %v1054_v35 = vpack.c.bf16 %v1053_v34, %v1052_v33 }
 0x2f6   : > { %2414 = vmatmul.mubr.bf16.vlgmr.msra.gmra.mrb[8].mxu0 %v1054_v35 }
 0x2f7   : > { %2453 = vmatprep.mubr.msk.bf16.mxu0 %vm3035_vm0, %v3034_v43  ;;  %2438 = vmatpush3.bf16.msra.mxu0 %v2703_v7 }
 0x2f8   : > { %2439 = vmatprep.subr.bf16.mxu0 %v3034_v43 }
 0x2fb   : > { %2440 = vmatpush3.bf16.msra.mxu0 %v2704_v8 }
 0x2fc   : > { %2441 = vmatprep.subr.bf16.mxu0 %v3034_v43 }
 0x2ff   : > { %2442 = vmatpush3.bf16.msra.mxu0 %v2705_v9 }
 0x300   : > { %2443 = vmatprep.subr.bf16.mxu0 %v3034_v43 }
 0x303   : > { %2444 = vmatpush3.bf16.msra.mxu0 %v2706_v10 }
 0x304   : > { %2445 = vmatprep.subr.bf16.mxu0 %v3034_v43 }
 0x307   : > { %2446 = vmatpush3.bf16.msra.mxu0 %v2707_v11 }
 0x308   : > { %2447 = vmatprep.subr.bf16.mxu0 %v3034_v43 }
 0x30b   : > { %2448 = vmatpush3.bf16.msra.mxu0 %v2708_v12  ;;  %v2719_v12 = vld [vmem:[#allocation7 + $0x140] sm:$0xff]  }
 0x30c   : > { %2449 = vmatprep.subr.bf16.mxu0 %v3034_v43 }
 0x30f   : > { %2450 = vmatpush3.bf16.msra.mxu0 %v2709_v13  ;;  %v2720_v13 = vld [vmem:[#allocation7 + $0x148] sm:$0xff]  }
 0x310   : > { %2451 = vmatprep.subr.bf16.mxu0 %v3034_v43 }
 0x313   : > { %2452 = vmatpush3.bf16.msra.mxu0 %v2710_v14  ;;  %v2721_v14 = vld [vmem:[#allocation7 + $0x150] sm:$0xff]  }
 0x314   : > { %2477 = vmatprep.subr.bf16.mxu0 %v3034_v43 }
 0x3c9   : > { %v1159_v46 = vpop.f32.mrb[8].mxu0 }
 0x3ca   : > { %v1160_v47 = vadd.f32 %v2158_v45, %v1159_v46  ;;  %v2415_v48 = vpop.f32.mrb[9].mxu0  ;;  %v2715_v46 = vld [vmem:[#allocation7 + $0x120] sm:$0xff]  }
 0x3cb   : > { %v1162_v49 = vpop.f32.mrb[10].mxu0  ;;  %v2717_v48 = vld [vmem:[#allocation7 + $0x130] sm:$0xff]  }
 0x3cc   : > { %v1166_v50 = vmin.f32 %v1160_v47, 20.0  ;;  %v1163_v51 = vadd.f32 %v2158_v45, %v1162_v49  ;;  %v2416_v52 = vpop.f32.mrb[11].mxu0  ;;  %v2714_v45 = vld [vmem:[#allocation7 + $0x118] sm:$0xff]  }
 0x3cd   : > { %v2718_v49 = vld [vmem:[#allocation7 + $0x138] sm:$0xff]  }
 0x3ce   : > { %v1168_v53 = vmul.f32 1.442695, %v1166_v50  ;;  %v1167_v54 = vmin.f32 %v1163_v51, 20.0  ;;  %v2176_v50 = vld [vmem:[#allocation10 + $0x4] ss:$0 sm:$0xff] }
 0x3d0   : > { %2759 = vpow2.f32 %v1168_v53  ;;  %v1170_v55 = vmul.f32 1.442695, %v1167_v54 }
 0x3d2   : > { %2761 = vpow2.f32 %v1170_v55 }
 0x3da   : > { %v2760_v56 = vpop.eup %2759 }
 0x3db   : > { %v1172_v57 = vadd.f32 2.0, %v2760_v56 }
 0x3dc   : > { %v2762_v58 = vpop.eup %2761 }
 0x3dd   : > { %v1174_v59 = vmul.f32 %v2760_v56, %v1172_v57  ;;  %v1173_v60 = vadd.f32 2.0, %v2762_v58 }
 0x3df   : > { %v1176_v61 = vadd.f32 2.0, %v1174_v59  ;;  %v1175_v62 = vmul.f32 %v2762_v58, %v1173_v60  ;;  %v1180_v1 = vmul.f32 %v1174_v59, %v1160_v47  ;;  %v2716_v47 = vld [vmem:[#allocation7 + $0x128] sm:$0xff]  }
 0x3e1   : > { %2763 = vrcp.f32 %v1176_v61  ;;  %v1177_v63 = vadd.f32 2.0, %v1175_v62  ;;  %v1181_v2 = vmul.f32 %v1175_v62, %v1163_v51 }
 0x3e3   : > { %2765 = vrcp.f32 %v1177_v63 }
 0x3eb   : > { %v2764_v0 = vpop.eup %2763 }
 0x3ec   : > { %v1182_v4 = vmul.f32 %v2764_v0, %v1180_v1 }
 0x3ed   : > { %v2766_v3 = vpop.eup %2765 }
 0x3ee   : > { %v1183_v5 = vmul.f32 %v2766_v3, %v1181_v2 }
 0x3f0   : > { %v1184_v6 = vpack.c.bf16 %v1183_v5, %v1182_v4 }
 0x3f2   : > { %2434 = vmatmul.mubr.bf16.vlgmr.msra.gmra.mrb[12].mxu1 %v1184_v6 }
 0x3f3   : > { %2473 = vmatprep.mubr.msk.bf16.mxu1 %vm3035_vm0, %v3034_v43  ;;  %2458 = vmatpush3.bf16.msra.mxu1 %v2711_v41 }
 0x3f4   : > { %2459 = vmatprep.subr.bf16.mxu1 %v3034_v43 }
 0x3f7   : > { %2460 = vmatpush3.bf16.msra.mxu1 %v2712_v42 }
 0x3f8   : > { %2461 = vmatprep.subr.bf16.mxu1 %v3034_v43 }
 0x3fb   : > { %2462 = vmatpush3.bf16.msra.mxu1 %v2713_v44 }
 0x3fc   : > { %2463 = vmatprep.subr.bf16.mxu1 %v3034_v43 }
 0x3ff   : > { %2464 = vmatpush3.bf16.msra.mxu1 %v2714_v45 }
 0x400   : > { %2465 = vmatprep.subr.bf16.mxu1 %v3034_v43 }
 0x403   : > { %2466 = vmatpush3.bf16.msra.mxu1 %v2715_v46 }
 0x404   : > { %2467 = vmatprep.subr.bf16.mxu1 %v3034_v43 }
 0x407   : > { %2468 = vmatpush3.bf16.msra.mxu1 %v2716_v47  ;;  %v2727_v47 = vld [vmem:[#allocation7 + $0x180] sm:$0xff]  }
 0x408   : > { %2469 = vmatprep.subr.bf16.mxu1 %v3034_v43 }
 0x40b   : > { %2470 = vmatpush3.bf16.msra.mxu1 %v2717_v48  ;;  %v2728_v48 = vld [vmem:[#allocation7 + $0x188] sm:$0xff]  }
 0x40c   : > { %2471 = vmatprep.subr.bf16.mxu1 %v3034_v43 }
 0x40f   : > { %2472 = vmatpush3.bf16.msra.mxu1 %v2718_v49  ;;  %v2729_v49 = vld [vmem:[#allocation7 + $0x190] sm:$0xff]  }
 0x410   : > { %2497 = vmatprep.subr.bf16.mxu1 %v3034_v43 }
 0x4c5   : > { %v1289_v16 = vpop.f32.mrb[12].mxu1 }
 0x4c6   : > { %v1290_v17 = vadd.f32 %v2167_v15, %v1289_v16  ;;  %v2435_v18 = vpop.f32.mrb[13].mxu1  ;;  %v2723_v16 = vld [vmem:[#allocation7 + $0x160] sm:$0xff]  }
 0x4c7   : > { %v1292_v19 = vpop.f32.mrb[14].mxu1  ;;  %v2725_v18 = vld [vmem:[#allocation7 + $0x170] sm:$0xff]  }
 0x4c8   : > { %v1296_v20 = vmin.f32 %v1290_v17, 20.0  ;;  %v1293_v21 = vadd.f32 %v2167_v15, %v1292_v19  ;;  %v2436_v22 = vpop.f32.mrb[15].mxu1  ;;  %v2722_v15 = vld [vmem:[#allocation7 + $0x158] sm:$0xff]  }
 0x4c9   : > { %v2726_v19 = vld [vmem:[#allocation7 + $0x178] sm:$0xff]  }
 0x4ca   : > { %v1298_v23 = vmul.f32 1.442695, %v1296_v20  ;;  %v1297_v24 = vmin.f32 %v1293_v21, 20.0  ;;  %v2185_v20 = vld [vmem:[#allocation10 + $0x5] ss:$0 sm:$0xff] }
 0x4cc   : > { %2767 = vpow2.f32 %v1298_v23  ;;  %v1300_v25 = vmul.f32 1.442695, %v1297_v24 }
 0x4ce   : > { %2769 = vpow2.f32 %v1300_v25 }
 0x4d6   : > { %v2768_v26 = vpop.eup %2767 }
 0x4d7   : > { %v1302_v27 = vadd.f32 2.0, %v2768_v26 }
 0x4d8   : > { %v2770_v28 = vpop.eup %2769 }
 0x4d9   : > { %v1304_v29 = vmul.f32 %v2768_v26, %v1302_v27  ;;  %v1303_v30 = vadd.f32 2.0, %v2770_v28 }
 0x4db   : > { %v1306_v31 = vadd.f32 2.0, %v1304_v29  ;;  %v1305_v32 = vmul.f32 %v2770_v28, %v1303_v30  ;;  %v1310_v35 = vmul.f32 %v1304_v29, %v1290_v17  ;;  %v2724_v17 = vld [vmem:[#allocation7 + $0x168] sm:$0xff]  }
 0x4dd   : > { %2771 = vrcp.f32 %v1306_v31  ;;  %v1307_v33 = vadd.f32 2.0, %v1305_v32  ;;  %v1311_v36 = vmul.f32 %v1305_v32, %v1293_v21 }
 0x4df   : > { %2773 = vrcp.f32 %v1307_v33 }
 0x4e7   : > { %v2772_v34 = vpop.eup %2771 }
 0x4e8   : > { %v1312_v38 = vmul.f32 %v2772_v34, %v1310_v35 }
 0x4e9   : > { %v2774_v37 = vpop.eup %2773 }
 0x4ea   : > { %v1313_v39 = vmul.f32 %v2774_v37, %v1311_v36 }
 0x4ec   : > { %v1314_v40 = vpack.c.bf16 %v1313_v39, %v1312_v38 }
 0x4ee   : > { %2454 = vmatmul.mubr.bf16.vlgmr.msra.gmra.mrb[12].mxu0 %v1314_v40 }
 0x4ef   : > { %2493 = vmatprep.mubr.msk.bf16.mxu0 %vm3035_vm0, %v3034_v43  ;;  %2478 = vmatpush3.bf16.msra.mxu0 %v2719_v12 }
 0x4f0   : > { %2479 = vmatprep.subr.bf16.mxu0 %v3034_v43 }
 0x4f3   : > { %2480 = vmatpush3.bf16.msra.mxu0 %v2720_v13 }
 0x4f4   : > { %2481 = vmatprep.subr.bf16.mxu0 %v3034_v43 }
 0x4f7   : > { %2482 = vmatpush3.bf16.msra.mxu0 %v2721_v14 }
 0x4f8   : > { %2483 = vmatprep.subr.bf16.mxu0 %v3034_v43 }
 0x4fb   : > { %2484 = vmatpush3.bf16.msra.mxu0 %v2722_v15 }
 0x4fc   : > { %2485 = vmatprep.subr.bf16.mxu0 %v3034_v43 }
 0x4ff   : > { %2486 = vmatpush3.bf16.msra.mxu0 %v2723_v16 }
 0x500   : > { %2487 = vmatprep.subr.bf16.mxu0 %v3034_v43 }
 0x503   : > { %2488 = vmatpush3.bf16.msra.mxu0 %v2724_v17  ;;  %v2735_v17 = vld [vmem:[#allocation8] sm:$0xff]  }
 0x504   : > { %2489 = vmatprep.subr.bf16.mxu0 %v3034_v43 }
 0x507   : > { %2490 = vmatpush3.bf16.msra.mxu0 %v2725_v18  ;;  %v2736_v18 = vld [vmem:[#allocation8 + $0x8] sm:$0xff]  }
 0x508   : > { %2491 = vmatprep.subr.bf16.mxu0 %v3034_v43 }
 0x50b   : > { %2492 = vmatpush3.bf16.msra.mxu0 %v2726_v19  ;;  %v2737_v19 = vld [vmem:[#allocation8 + $0x10] sm:$0xff]  }
 0x50c   : > { %2517 = vmatprep.subr.bf16.mxu0 %v3034_v43 }
 0x5c1   : > { %v1419_v51 = vpop.f32.mrb[12].mxu0 }
 0x5c2   : > { %v1420_v52 = vadd.f32 %v2176_v50, %v1419_v51  ;;  %v2455_v53 = vpop.f32.mrb[13].mxu0  ;;  %v2731_v51 = vld [vmem:[#allocation7 + $0x1a0] sm:$0xff]  }
 0x5c3   : > { %v1422_v54 = vpop.f32.mrb[14].mxu0  ;;  %v2733_v53 = vld [vmem:[#allocation7 + $0x1b0] sm:$0xff]  }
 0x5c4   : > { %v1426_v55 = vmin.f32 %v1420_v52, 20.0  ;;  %v1423_v56 = vadd.f32 %v2176_v50, %v1422_v54  ;;  %v2456_v57 = vpop.f32.mrb[15].mxu0  ;;  %v2730_v50 = vld [vmem:[#allocation7 + $0x198] sm:$0xff]  }
 0x5c5   : > { %v2734_v54 = vld [vmem:[#allocation7 + $0x1b8] sm:$0xff]  }
 0x5c6   : > { %v1428_v58 = vmul.f32 1.442695, %v1426_v55  ;;  %v1427_v59 = vmin.f32 %v1423_v56, 20.0  ;;  %v2194_v55 = vld [vmem:[#allocation10 + $0x6] ss:$0 sm:$0xff] }
 0x5c8   : > { %2775 = vpow2.f32 %v1428_v58  ;;  %v1430_v60 = vmul.f32 1.442695, %v1427_v59 }
 0x5ca   : > { %2777 = vpow2.f32 %v1430_v60 }
 0x5d2   : > { %v2776_v61 = vpop.eup %2775 }
 0x5d3   : > { %v1432_v62 = vadd.f32 2.0, %v2776_v61 }
 0x5d4   : > { %v2778_v63 = vpop.eup %2777 }
 0x5d5   : > { %v1434_v0 = vmul.f32 %v2776_v61, %v1432_v62  ;;  %v1433_v1 = vadd.f32 2.0, %v2778_v63 }
 0x5d7   : > { %v1436_v2 = vadd.f32 2.0, %v1434_v0  ;;  %v1435_v3 = vmul.f32 %v2778_v63, %v1433_v1  ;;  %v1440_v6 = vmul.f32 %v1434_v0, %v1420_v52  ;;  %v2732_v52 = vld [vmem:[#allocation7 + $0x1a8] sm:$0xff]  }
 0x5d9   : > { %2779 = vrcp.f32 %v1436_v2  ;;  %v1437_v4 = vadd.f32 2.0, %v1435_v3  ;;  %v1441_v7 = vmul.f32 %v1435_v3, %v1423_v56 }
 0x5db   : > { %2781 = vrcp.f32 %v1437_v4 }
 0x5e3   : > { %v2780_v5 = vpop.eup %2779 }
 0x5e4   : > { %v1442_v9 = vmul.f32 %v2780_v5, %v1440_v6 }
 0x5e5   : > { %v2782_v8 = vpop.eup %2781 }
 0x5e6   : > { %v1443_v10 = vmul.f32 %v2782_v8, %v1441_v7 }
 0x5e8   : > { %v1444_v11 = vpack.c.bf16 %v1443_v10, %v1442_v9 }
 0x5ea   : > { %2474 = vmatmul.mubr.bf16.vlgmr.msra.gmra.mrb[16].mxu1 %v1444_v11 }
 0x5eb   : > { %2513 = vmatprep.mubr.msk.bf16.mxu1 %vm3035_vm0, %v3034_v43  ;;  %2498 = vmatpush3.bf16.msra.mxu1 %v2727_v47 }
 0x5ec   : > { %2499 = vmatprep.subr.bf16.mxu1 %v3034_v43 }
 0x5ef   : > { %2500 = vmatpush3.bf16.msra.mxu1 %v2728_v48 }
 0x5f0   : > { %2501 = vmatprep.subr.bf16.mxu1 %v3034_v43 }
 0x5f3   : > { %2502 = vmatpush3.bf16.msra.mxu1 %v2729_v49 }
 0x5f4   : > { %2503 = vmatprep.subr.bf16.mxu1 %v3034_v43 }
 0x5f7   : > { %2504 = vmatpush3.bf16.msra.mxu1 %v2730_v50 }
 0x5f8   : > { %2505 = vmatprep.subr.bf16.mxu1 %v3034_v43 }
 0x5fb   : > { %2506 = vmatpush3.bf16.msra.mxu1 %v2731_v51  ;;  %v2212_v51 = vld [vmem:[#allocation10 + $0x8] ss:$0 sm:$0xff] }
 0x5fc   : > { %2507 = vmatprep.subr.bf16.mxu1 %v3034_v43 }
 0x5ff   : > { %2508 = vmatpush3.bf16.msra.mxu1 %v2732_v52 }
 0x600   : > { %2509 = vmatprep.subr.bf16.mxu1 %v3034_v43 }
 0x603   : > { %2510 = vmatpush3.bf16.msra.mxu1 %v2733_v53 }
 0x604   : > { %2511 = vmatprep.subr.bf16.mxu1 %v3034_v43 }
 0x607   : > { %2512 = vmatpush3.bf16.msra.mxu1 %v2734_v54 }
 0x6bd   : > { %v1549_v21 = vpop.f32.mrb[16].mxu1 }
 0x6be   : > { %v1550_v22 = vadd.f32 %v2185_v20, %v1549_v21  ;;  %v2475_v23 = vpop.f32.mrb[17].mxu1  ;;  %v2739_v21 = vld [vmem:[#allocation8 + $0x20] sm:$0xff]  }
 0x6bf   : > { %v1552_v24 = vpop.f32.mrb[18].mxu1  ;;  %v2741_v23 = vld [vmem:[#allocation8 + $0x30] sm:$0xff]  }
 0x6c0   : > { %v1556_v25 = vmin.f32 %v1550_v22, 20.0  ;;  %v1553_v26 = vadd.f32 %v2185_v20, %v1552_v24  ;;  %v2476_v27 = vpop.f32.mrb[19].mxu1  ;;  %v2738_v20 = vld [vmem:[#allocation8 + $0x18] sm:$0xff]  }
 0x6c1   : > { %v2742_v24 = vld [vmem:[#allocation8 + $0x38] sm:$0xff]  }
 0x6c2   : > { %v1558_v28 = vmul.f32 1.442695, %v1556_v25  ;;  %v1557_v29 = vmin.f32 %v1553_v26, 20.0  ;;  %v2203_v25 = vld [vmem:[#allocation10 + $0x7] ss:$0 sm:$0xff] }
 0x6c4   : > { %2783 = vpow2.f32 %v1558_v28  ;;  %v1560_v30 = vmul.f32 1.442695, %v1557_v29 }
 0x6c6   : > { %2785 = vpow2.f32 %v1560_v30 }
 0x6ce   : > { %v2784_v31 = vpop.eup %2783 }
 0x6cf   : > { %v1562_v32 = vadd.f32 2.0, %v2784_v31 }
 0x6d0   : > { %v2786_v33 = vpop.eup %2785 }
 0x6d1   : > { %v1564_v34 = vmul.f32 %v2784_v31, %v1562_v32  ;;  %v1563_v35 = vadd.f32 2.0, %v2786_v33 }
 0x6d3   : > { %v1566_v36 = vadd.f32 2.0, %v1564_v34  ;;  %v1565_v37 = vmul.f32 %v2786_v33, %v1563_v35  ;;  %v1570_v40 = vmul.f32 %v1564_v34, %v1550_v22  ;;  %v2740_v22 = vld [vmem:[#allocation8 + $0x28] sm:$0xff]  }
 0x6d5   : > { %2787 = vrcp.f32 %v1566_v36  ;;  %v1567_v38 = vadd.f32 2.0, %v1565_v37  ;;  %v1571_v41 = vmul.f32 %v1565_v37, %v1553_v26 }
 0x6d7   : > { %2789 = vrcp.f32 %v1567_v38 }
 0x6df   : > { %v2788_v39 = vpop.eup %2787 }
 0x6e0   : > { %v1572_v44 = vmul.f32 %v2788_v39, %v1570_v40 }
 0x6e1   : > { %v2790_v42 = vpop.eup %2789 }
 0x6e2   : > { %v1573_v45 = vmul.f32 %v2790_v42, %v1571_v41 }
 0x6e4   : > { %v1574_v46 = vpack.c.bf16 %v1573_v45, %v1572_v44 }
 0x6e6   : > { %2494 = vmatmul.mubr.bf16.vlgmr.msra.gmra.mrb[16].mxu0 %v1574_v46 }
 0x6e7   : > { %2533 = vmatprep.mubr.msk.bf16.mxu0 %vm3035_vm0, %v3034_v43  ;;  %2518 = vmatpush3.bf16.msra.mxu0 %v2735_v17 }
 0x6e8   : > { %2519 = vmatprep.subr.bf16.mxu0 %v3034_v43 }
 0x6eb   : > { %2520 = vmatpush3.bf16.msra.mxu0 %v2736_v18 }
 0x6ec   : > { %2521 = vmatprep.subr.bf16.mxu0 %v3034_v43 }
 0x6ef   : > { %2522 = vmatpush3.bf16.msra.mxu0 %v2737_v19 }
 0x6f0   : > { %2523 = vmatprep.subr.bf16.mxu0 %v3034_v43 }
 0x6f3   : > { %2524 = vmatpush3.bf16.msra.mxu0 %v2738_v20 }
 0x6f4   : > { %2525 = vmatprep.subr.bf16.mxu0 %v3034_v43 }
 0x6f7   : > { %2526 = vmatpush3.bf16.msra.mxu0 %v2739_v21 }
 0x6f8   : > { %2527 = vmatprep.subr.bf16.mxu0 %v3034_v43 }
 0x6fb   : > { %2528 = vmatpush3.bf16.msra.mxu0 %v2740_v22 }
 0x6fc   : > { %2529 = vmatprep.subr.bf16.mxu0 %v3034_v43 }
 0x6ff   : > { %2530 = vmatpush3.bf16.msra.mxu0 %v2741_v23 }
 0x700   : > { %2531 = vmatprep.subr.bf16.mxu0 %v3034_v43 }
 0x703   : > { %2532 = vmatpush3.bf16.msra.mxu0 %v2742_v24 }
 0x7b9   : > { %v1679_v56 = vpop.f32.mrb[16].mxu0 }
 0x7ba   : > { %v1680_v57 = vadd.f32 %v2194_v55, %v1679_v56  ;;  %v2495_v58 = vpop.f32.mrb[17].mxu0 }
 0x7bb   : > { %v1682_v59 = vpop.f32.mrb[18].mxu0 }
 0x7bc   : > { %v1686_v60 = vmin.f32 %v1680_v57, 20.0  ;;  %v1683_v61 = vadd.f32 %v2194_v55, %v1682_v59  ;;  %v2496_v62 = vpop.f32.mrb[19].mxu0 }
 0x7be   : > { %v1688_v63 = vmul.f32 1.442695, %v1686_v60  ;;  %v1687_v0 = vmin.f32 %v1683_v61, 20.0 }
 0x7c0   : > { %2791 = vpow2.f32 %v1688_v63  ;;  %v1690_v1 = vmul.f32 1.442695, %v1687_v0 }
 0x7c2   : > { %2793 = vpow2.f32 %v1690_v1 }
 0x7ca   : > { %v2792_v2 = vpop.eup %2791 }
 0x7cb   : > { %v1692_v3 = vadd.f32 2.0, %v2792_v2 }
 0x7cc   : > { %v2794_v4 = vpop.eup %2793 }
 0x7cd   : > { %v1694_v5 = vmul.f32 %v2792_v2, %v1692_v3  ;;  %v1693_v6 = vadd.f32 2.0, %v2794_v4 }
 0x7cf   : > { %v1696_v7 = vadd.f32 2.0, %v1694_v5  ;;  %v1695_v8 = vmul.f32 %v2794_v4, %v1693_v6  ;;  %v1700_v11 = vmul.f32 %v1694_v5, %v1680_v57 }
 0x7d1   : > { %2795 = vrcp.f32 %v1696_v7  ;;  %v1697_v9 = vadd.f32 2.0, %v1695_v8  ;;  %v1701_v12 = vmul.f32 %v1695_v8, %v1683_v61 }
 0x7d3   : > { %2797 = vrcp.f32 %v1697_v9 }
 0x7db   : > { %v2796_v10 = vpop.eup %2795 }
 0x7dc   : > { %v1702_v14 = vmul.f32 %v2796_v10, %v1700_v11 }
 0x7dd   : > { %v2798_v13 = vpop.eup %2797 }
 0x7de   : > { %v1703_v15 = vmul.f32 %v2798_v13, %v1701_v12 }
 0x7e0   : > { %v1704_v16 = vpack.c.bf16 %v1703_v15, %v1702_v14 }
 0x7e2   : > { %2514 = vmatmul.mubr.bf16.vlgmr.msra.gmra.mrb[20].mxu1 %v1704_v16 }
 0x8b5   : > { %v1809_v26 = vpop.f32.mrb[20].mxu1 }
 0x8b6   : > { %v1810_v27 = vadd.f32 %v2203_v25, %v1809_v26  ;;  %v2515_v28 = vpop.f32.mrb[21].mxu1 }
 0x8b7   : > { %v1812_v29 = vpop.f32.mrb[22].mxu1 }
 0x8b8   : > { %v1816_v30 = vmin.f32 %v1810_v27, 20.0  ;;  %v1813_v31 = vadd.f32 %v2203_v25, %v1812_v29  ;;  %v2516_v32 = vpop.f32.mrb[23].mxu1 }
 0x8ba   : > { %v1818_v33 = vmul.f32 1.442695, %v1816_v30  ;;  %v1817_v34 = vmin.f32 %v1813_v31, 20.0 }
 0x8bc   : > { %2799 = vpow2.f32 %v1818_v33  ;;  %v1820_v35 = vmul.f32 1.442695, %v1817_v34 }
 0x8be   : > { %2801 = vpow2.f32 %v1820_v35 }
 0x8c6   : > { %v2800_v36 = vpop.eup %2799 }
 0x8c7   : > { %v1822_v37 = vadd.f32 2.0, %v2800_v36 }
 0x8c8   : > { %v2802_v38 = vpop.eup %2801 }
 0x8c9   : > { %v1824_v43 = vmul.f32 %v2800_v36, %v1822_v37  ;;  %v1823_v39 = vadd.f32 2.0, %v2802_v38 }
 0x8cb   : > { %v1826_v40 = vadd.f32 2.0, %v1824_v43  ;;  %v1825_v41 = vmul.f32 %v2802_v38, %v1823_v39  ;;  %v1830_v45 = vmul.f32 %v1824_v43, %v1810_v27 }
 0x8cd   : > { %2803 = vrcp.f32 %v1826_v40  ;;  %v1827_v42 = vadd.f32 2.0, %v1825_v41  ;;  %v1831_v46 = vmul.f32 %v1825_v41, %v1813_v31 }
 0x8cf   : > { %2805 = vrcp.f32 %v1827_v42 }
 0x8d7   : > { %v2804_v44 = vpop.eup %2803 }
 0x8d8   : > { %v1832_v48 = vmul.f32 %v2804_v44, %v1830_v45 }
 0x8d9   : > { %v2806_v47 = vpop.eup %2805 }
 0x8da   : > { %v1833_v49 = vmul.f32 %v2806_v47, %v1831_v46 }
 0x8dc   : > { %v1834_v50 = vpack.c.bf16 %v1833_v49, %v1832_v48 }
 0x8de   : > { %2534 = vmatmul.mubr.bf16.vlgmr.msra.gmra.mrb[20].mxu0 %v1834_v50 }
 0x9b0   : > { %1954 = sbr.rel (!%p3494_p1) target bundleno = 2515 (0x9d3), region = 64 }
 0x9b1   : > { %v1938_v52 = vpop.f32.mrb[20].mxu0 }
 0x9b2   : > { %v1939_v53 = vadd.f32 %v2212_v51, %v1938_v52  ;;  %v2535_v54 = vpop.f32.mrb[21].mxu0 }
 0x9b3   : > { %v1941_v55 = vpop.f32.mrb[22].mxu0 }
 0x9b4   : > { %1945 = vst [vmem:[%s308_s7] sm:$0xff] %v1939_v53  ;;  %v1942_v56 = vadd.f32 %v2212_v51, %v1941_v55  ;;  %v2536_v57 = vpop.f32.mrb[23].mxu0 }
 0x9b6   : > { %1946 = vst [vmem:[%s308_s7 + $0x8] sm:$0xff] %v1942_v56 }
 0x9b7   : > { %s3505_s25 = smov (!%p1957_p3, %s1956_s25), 2 }
 0x9b8   : > { %s3405_s9 = sshll.u32 %s3505_s25, 7 }
 0x9b9   : > { %s1961_s13 = ssub.s32 256, %s3405_s9 }
 0x9ba   : > { %1962 = vsyncadd %s1948_s10, %s1961_s13  ;;  %p2224_p5 = scmp.ne.s32.totalorder %s3405_s9, 0  ;;  %s2230_s15 = sshll.u32 %s3090_s22, 8 }
 0x9bb   : > { %s3415_s23 = scalar_lea.hbm %s3468_s5, %s2230_s15  ;;  %s1967_s1 = sshll.u32 %s308_s7, 4  ;;  %s3417_s1 = int_to_ptr.vmem [resolvable:$true] %s1967_s1 }
 0x9bc   : > { %s2947_s6 = scalar_lea.vmem %s3417_s1, %s3405_s9  ;;  %s3036_s27 = smov [#allocation11]  }
 0x9bd   : > { %p2948_p6 = scmp.ne.s32.totalorder %s3417_s1, %s2947_s6  ;;  %s2951_s17 = sshll.u32 %s3036_s27, 4  ;;  %s2952_s17 = int_to_ptr.vmem [resolvable:$false] %s2951_s17 }
 0x9be   : > { %s2953_s22 = scalar_lea.vmem %s2952_s17, 512  ;;  %p2954_p0 = scmp.lt.s32.totalorder %s3417_s1, %s2952_s17 }
 0x9bf   : > { %p2949_p11 = pnand %p2948_p6, %p2224_p5  ;;  %p2955_p12 = scmp.lt.s32.totalorder %s2953_s22, %s2947_s6 }
 0x9c1   : > { %p2950_p13 = pneg %p2949_p11  ;;  %p2956_p7 = por %p2955_p12, %p2954_p0 }
 0x9c3   : > { %p2957_p2 = pnand %p2956_p7, %p2950_p13 }
 0x9c5   : > { %2960 = shalt.err (!%p2957_p2)
}
 0x9c6   : > { %s2961_s16 = scalar_lea.hbm %s3415_s23, %s3405_s9  ;;  %s2965_s24 = scalar_lea.hbm %s3468_s5, 384 }
 0x9c7   : > { %p2962_p8 = scmp.ne.s32.totalorder %s3415_s23, %s2961_s16  ;;  %p2966_p1 = scmp.lt.u32.totalorder %s3415_s23, %s3468_s5 }
 0x9c8   : > { %p2967_p3 = scmp.lt.u32.totalorder %s2965_s24, %s2961_s16  ;;  %p2969_p11 = scmp.lt.u32.totalorder %s2961_s16, %s3415_s23 }
 0x9c9   : > { %p2963_p9 = pnand %p2962_p8, %p2224_p5 }
 0x9ca   : > { %p2968_p6 = por %p2967_p3, %p2966_p1 }
 0x9cb   : > { %p2964_p10 = pneg %p2963_p9 }
 0x9cc   : > { %p2970_p13 = por %p2969_p11, %p2968_p6 }
 0x9ce   : > { %p2971_p0 = pnand %p2970_p13, %p2964_p10 }
 0x9d0   : > { %2974 = shalt.err (!%p2971_p0)
}
 0x9d1   : > { %s3037_s7 = smov 128   ;;  %s3038_s14 = smov 8  }
 0x9d2   : > { %1973 = dma.vmem_to_hbm [thread:$0]  (%p2224_p5), %s3417_s1, %s3405_s9, %s3415_s23, %s1948_s10, %s3037_s7, %s3037_s7, %s3038_s14  }
 0x9d3 PF: > { %s3495_s25 = sld [smem:[#allocation18_spill]]  ;;  %s1982_s13 = sand.u32 1, %s3009_s18  }
 0x9d4   : > { %s1983_s15 = scalar_lea.sflag [#allocation4], %s1982_s13 }
 0x9d9   : > { %p3496_p12 = scmp.ne.s32.totalorder %s3495_s25, 0 }
 0x9db   : > { %p2572_p7 = pnand %p2084_p4, %p3496_p12 }
 0x9dd   : > { %3004 = dma.done.wait (!%p2572_p7), %s1983_s15, 256  }
 0x9de   : > { %3006 = vsyncadd (!%p2572_p7), %s1983_s15, 4294967040  ;;  %s3497_s21 = sld [smem:[#allocation16_spill]]  ;;  %s3498_s30 = sld [smem:[#allocation17_spill]] }
 0x9df   : > { %s3499_s18 = smov %s3013_s19  ;;  %s3500_s19 = smov %s3017_s20 }
 0x9e4   : > { %p20_p2 = scmp.ge.s32.totalorder %s3497_s21, 4   ;;  %s3501_s20 = smov %s3498_s30 }
 0x9e6   :  { %22 = sbr.rel (!%p20_p2) target bundleno = 9 (0x9), region = 107 }
 0x9ed   :  { %1988 = vsyncpa [#allocation3], 1 }
 0x9ee   :  { %1990 = vsyncpa [#allocation3 + $0x1], 1 }
 0x9ef   :  { %1991 = vsyncpa [#allocation6], 1 }
 0x9f0   :  { %1992 = vsyncpa [#allocation9], 1 }
 0x9f1   :  { %1993 = vsyncpa [#allocation4], 1 }
 0x9f2   :  { %1995 = vsyncpa [#allocation4 + $0x1], 1 }

</bundles_post_ra>
